<compile_context>
chip_gen: v5e
topology: v5e:2x2
jax: 0.10.0
libtpu: 0.0.40
codegen_flags: <defaults>
</compile_context>

<pallas_src>
import functools

import jax
import jax.numpy as jnp
from jax.experimental import pallas as pl
from jax.experimental.pallas import tpu as pltpu


def _round_up(x, m):
    return (x + m - 1) // m * m


def _rel_edge_kernel(feat_ref, src_col_ref, dst_col_ref, src_row_ref, ef_ref,
                     w1a_ref, w1b_ref, w1e_ref, b1_ref,
                     w3ab_ref, m23_ref, b3_ref, w4_ref, b4_ref,
                     out_ref,
                     acc_ref, a_ref, b_ref, *, f_out):
    step = pl.program_id(0)
    n_pad = a_ref.shape[0]
    te = src_col_ref.shape[0]

    # ---- once, on the first edge tile: zero the scatter accumulator and
    # project the resident node features into F_out-wide space -------------
    @pl.when(step == 0)
    def _init():
        acc_ref[...] = jnp.zeros_like(acc_ref)
        feats = feat_ref[...]
        a = jnp.dot(feats, w1a_ref[...], preferred_element_type=jnp.float32)
        b = jnp.dot(feats, w1b_ref[...], preferred_element_type=jnp.float32)
        a_ref[...] = a.astype(jnp.bfloat16)
        b_ref[...] = b.astype(jnp.bfloat16)

    # ---- per edge tile: gather, pre-W2 edge MLP, fused scatter(+count) ----
    lane_n = jax.lax.broadcasted_iota(jnp.int32, (te, n_pad), 1)
    onehot_src_en = jnp.where(lane_n == src_col_ref[...], 1.0, 0.0).astype(jnp.bfloat16)
    onehot_dst_en = jnp.where(lane_n == dst_col_ref[...], 1.0, 0.0).astype(jnp.bfloat16)
    ga = jnp.dot(onehot_src_en, a_ref[...], preferred_element_type=jnp.float32)
    gb = jnp.dot(onehot_dst_en, b_ref[...], preferred_element_type=jnp.float32)
    ce = jnp.dot(ef_ref[...], w1e_ref[...], preferred_element_type=jnp.float32)

    r = jnp.maximum(ga + gb + ce + b1_ref[...], 0.0)        # relu(W1 . cat(...))
    # lane `f_out` is a reserved (zero-padded) lane: put 1.0 there so the
    # scatter matmul below also accumulates the per-node edge count.
    lane_o = jax.lax.broadcasted_iota(jnp.int32, r.shape, 1)
    r = jnp.where(lane_o == f_out, 1.0, r)

    # scatter-add by src:  acc[n, :] += sum_e [src[e] == n] * r[e, :]
    sub_n = jax.lax.broadcasted_iota(jnp.int32, (n_pad, te), 0)
    onehot_src_ne = jnp.where(sub_n == src_row_ref[...], 1.0, 0.0).astype(jnp.bfloat16)
    acc_ref[...] += jnp.dot(onehot_src_ne, r.astype(jnp.bfloat16),
                            preferred_element_type=jnp.float32)

    # ---- once, after the last edge tile: node-level epilogue --------------
    # acc = [ R | deg | 0 ... ] with R = scatter_sum(relu(W1 . cat)).
    # W2/b2 and the scatter base were folded into W3ab / M23 in the wrapper:
    #   z = relu(feat @ W3ab + acc @ M23 + b3) @ W4 + b4
    @pl.when(step == pl.num_programs(0) - 1)
    def _finalize():
        feats = feat_ref[...]
        z1 = jnp.dot(feats, w3ab_ref[...], preferred_element_type=jnp.float32)
        z1 = z1 + jnp.dot(acc_ref[...], m23_ref[...],
                          preferred_element_type=jnp.float32)
        z1 = jnp.maximum(z1 + b3_ref[...], 0.0)
        z = jnp.dot(z1, w4_ref[...], preferred_element_type=jnp.float32)
        out_ref[...] = (z + b4_ref[...]).astype(out_ref.dtype)


def rel_edge_ml_conv(features, edge_index, edge_features, params, *, edge_tile=128):
    """features: (N, F_in) f32; edge_index: (2, E) int; edge_features: (E, Fe) or None."""
    src = edge_index[0].astype(jnp.int32)
    dst = edge_index[1].astype(jnp.int32)
    if edge_features is None:
        # TODO(synk): fuse the default |feat[src] - feat[dst]| edge features into the kernel.
        edge_features = jnp.abs(features[src] - features[dst])

    N, F = features.shape
    E = src.shape[0]
    Fe = edge_features.shape[1]
    W1, b1 = params["W1"], params["b1"]
    W2, b2 = params["W2"], params["b2"]
    W3, b3 = params["W3"], params["b3"]
    W4, b4 = params["W4"], params["b4"]
    F_out = W1.shape[1]

    # Split W1/W3 along the input dim; cat order is (feat[src], edge_feat, feat[dst]).
    W1a, W1e, W1b = W1[:F], W1[F:F + Fe], W1[F + Fe:]
    W3a, W3b = W3[:F], W3[F:]
    # Fold W2/b2 and the scatter base (s = feat + R @ W2 + deg * b2) into the W3 stage:
    #   feat@W3a + s@W3b = feat@(W3a + W3b) + R@(W2@W3b) + deg*(b2@W3b)
    W3ab = W3a + W3b                 # (F, F_out)      coefficient of feat
    M23 = W2 @ W3b                   # (F_out, F_out)  coefficient of R
    v23 = b2 @ W3b                   # (F_out,)        coefficient of deg

    # Lane-dense padding (multiples of 128); one extra lane reserved for deg.
    NP = _round_up(max(N, 1), 128)
    FP = _round_up(F, 128)
    FEP = _round_up(Fe, 128)
    OP = _round_up(F_out + 1, 128)
    TE = edge_tile
    EP = _round_up(max(E, 1), TE)

    def pad2(w, rows, cols, dtype=jnp.float32):
        out = jnp.zeros((rows, cols), jnp.float32).at[:w.shape[0], :w.shape[1]].set(w)
        return out.astype(dtype)

    def pad_row(v, cols):
        return jnp.zeros((1, cols), jnp.float32).at[0, :v.shape[0]].set(v)

    feats_p = pad2(features, NP, FP)
    ef_p = pad2(edge_features, EP, FEP, jnp.bfloat16)       # bf16 stream: half the DMA
    idx_pad = jnp.full((EP,), -1, jnp.int32)                # -1: padded edges match no node
    src_p = idx_pad.at[:E].set(src)
    dst_p = idx_pad.at[:E].set(dst)
    src_col, dst_col = src_p.reshape(EP, 1), dst_p.reshape(EP, 1)  # sublane layout (gathers)
    src_row = src_p.reshape(1, EP)                                 # lane layout (scatter)

    w1a_p, w1b_p = pad2(W1a, FP, OP), pad2(W1b, FP, OP)
    w1e_p = pad2(W1e, FEP, OP, jnp.bfloat16)
    b1_p = pad_row(b1, OP)
    w3ab_p = pad2(W3ab, FP, OP)
    m23_p = pad2(M23, OP, OP).at[F_out, :F_out].set(v23)    # row F_out multiplies the deg lane
    b3_p = pad_row(b3, OP)
    w4_p = pad2(W4, OP, OP)
    b4_p = pad_row(b4, OP)

    def resident(shape):
        return pl.BlockSpec(shape, lambda e: (0,) * len(shape))

    grid = (EP // TE,)
    out = pl.pallas_call(
        functools.partial(_rel_edge_kernel, f_out=F_out),
        out_shape=jax.ShapeDtypeStruct((NP, OP), jnp.float32),
        grid=grid,
        in_specs=[
            resident((NP, FP)),                          # features (resident)
            pl.BlockSpec((TE, 1), lambda e: (e, 0)),     # src indices, column layout
            pl.BlockSpec((TE, 1), lambda e: (e, 0)),     # dst indices, column layout
            pl.BlockSpec((1, TE), lambda e: (0, e)),     # src indices, row layout
            pl.BlockSpec((TE, FEP), lambda e: (e, 0)),   # edge features (bf16 stream)
            resident((FP, OP)), resident((FP, OP)),      # W1a, W1b
            resident((FEP, OP)), resident((1, OP)),      # W1e, b1
            resident((FP, OP)), resident((OP, OP)),      # W3ab, M23 (+deg row)
            resident((1, OP)), resident((OP, OP)),       # b3, W4
            resident((1, OP)),                           # b4
        ],
        out_specs=pl.BlockSpec((NP, OP), lambda e: (0, 0)),
        scratch_shapes=[
            pltpu.VMEM((NP, OP), jnp.float32),           # scatter accumulator [R | deg]
            pltpu.VMEM((NP, OP), jnp.bfloat16),          # A = feat @ W1a
            pltpu.VMEM((NP, OP), jnp.bfloat16),          # B = feat @ W1b
        ],
        compiler_params=pltpu.CompilerParams(
            # Sequential reduction over edge tiles (resident accumulator).
            dimension_semantics=("arbitrary",),
            # Explicit scoped-VMEM limit with headroom under v7x's 64 MiB
            # physical VMEM (this kernel's working set is ~2 MiB at TE=128).
            vmem_limit_bytes=48 * 1024 * 1024,
        ),
    )(feats_p, src_col, dst_col, src_row, ef_p,
      w1a_p, w1b_p, w1e_p, b1_p, w3ab_p, m23_p, b3_p, w4_p, b4_p)
    return out[:N, :F_out]


def _xavier_uniform(key, shape, gain):
    fan_in, fan_out = shape
    bound = gain * (6.0 / (fan_in + fan_out)) ** 0.5
    return jax.random.uniform(key, shape, jnp.float32, -bound, bound)


def init_params(key, in_node_features, out_features, in_edge_features=None):
    if in_edge_features is None:
        in_edge_features = in_node_features
    gain = 2.0 ** 0.5                       # nn.init.calculate_gain('relu')
    F, Fo, Fe = in_node_features, out_features, in_edge_features
    k1, k2, k3, k4 = jax.random.split(key, 4)
    # Weights stored transposed as (in, out) so forward is x @ W + b.
    W1 = _xavier_uniform(k1, (2 * F + Fe, Fo), gain)
    W2 = _xavier_uniform(k2, (Fo, F), gain)
    W3 = _xavier_uniform(k3, (2 * F, Fo), gain)
    lim = 1.0 / (Fo ** 0.5)                 # W4 keeps default nn.Linear init (not reset).
    W4 = jax.random.uniform(k4, (Fo, Fo), jnp.float32, -lim, lim)
    zeros = lambda n: jnp.zeros((n,), jnp.float32)
    return dict(W1=W1, b1=zeros(Fo), W2=W2, b2=zeros(F),
                W3=W3, b3=zeros(Fo), W4=W4, b4=zeros(Fo))


def _reference(features, edge_index, edge_features, params):
    """Pure-JAX reference mirroring the PyTorch forward (f32)."""
    src, dst = edge_index[0], edge_index[1]
    if edge_features is None:
        edge_features = jnp.abs(features[src] - features[dst])
    h_neigh = jnp.concatenate([features[src], edge_features, features[dst]], axis=-1)
    h_neigh = jax.nn.relu(h_neigh @ params["W1"] + params["b1"])
    h_neigh = h_neigh @ params["W2"] + params["b2"]
    s = features.at[src].add(h_neigh)       # scatter 'sum' with out = features.clone()
    z = jax.nn.relu(jnp.concatenate([features, s], axis=-1) @ params["W3"] + params["b3"])
    return z @ params["W4"] + params["b4"]


if __name__ == "__main__":
    key = jax.random.PRNGKey(0)
    N, E = 24, 200
    in_features, out_features, in_edge_features = 32, 16, 8

    k_feat, k_src, k_dst, k_ef, k_par = jax.random.split(key, 5)
    features = jax.random.normal(k_feat, (N, in_features), jnp.float32)
    src = jax.random.randint(k_src, (E,), 0, N, jnp.int32)   # edge_index[0]
    dst = jax.random.randint(k_dst, (E,), 0, N, jnp.int32)   # edge_index[1]
    edge_index = jnp.stack([src, dst])
    edge_features = jax.random.normal(k_ef, (E, in_edge_features), jnp.float32)
    params = init_params(k_par, in_features, out_features, in_edge_features)

    out = rel_edge_ml_conv(features, edge_index, edge_features, params, edge_tile=128)
    out = jax.block_until_ready(out)

    ref = _reference(features, edge_index, edge_features, params)
    assert out.shape == (N, out_features)
    # bf16 operands on the E-sized matmuls => scale-relative tolerance.
    scale = float(jnp.max(jnp.abs(ref)))
    max_err = float(jnp.max(jnp.abs(out - ref)))
    assert max_err <= 2e-2 * scale + 1e-4, f"mismatch: max_err={max_err:.4g}, scale={scale:.4g}"
    print("KERNEL_OK")
</pallas_src>

<mosaic_0001>
module attributes {stable_mosaic.version = 11 : i64} {
  func.func @_rel_edge_kernel(%arg0: i32, %arg1: memref<128x128xf32, #tpu.memory_space<vmem>>, %arg2: memref<128x1xi32, #tpu.memory_space<vmem>>, %arg3: memref<128x1xi32, #tpu.memory_space<vmem>>, %arg4: memref<1x128xi32, #tpu.memory_space<vmem>>, %arg5: memref<128x128xbf16, #tpu.memory_space<vmem>>, %arg6: memref<128x128xf32, #tpu.memory_space<vmem>>, %arg7: memref<128x128xf32, #tpu.memory_space<vmem>>, %arg8: memref<128x128xbf16, #tpu.memory_space<vmem>>, %arg9: memref<1x128xf32, #tpu.memory_space<vmem>>, %arg10: memref<128x128xf32, #tpu.memory_space<vmem>>, %arg11: memref<128x128xf32, #tpu.memory_space<vmem>>, %arg12: memref<1x128xf32, #tpu.memory_space<vmem>>, %arg13: memref<128x128xf32, #tpu.memory_space<vmem>>, %arg14: memref<1x128xf32, #tpu.memory_space<vmem>>, %arg15: memref<128x128xf32, #tpu.memory_space<vmem>>, %arg16: memref<128x128xf32, #tpu.memory_space<vmem>>, %arg17: memref<128x128xbf16, #tpu.memory_space<vmem>>, %arg18: memref<128x128xbf16, #tpu.memory_space<vmem>>) attributes {dimension_semantics = [#tpu.dimension_semantics<arbitrary>], iteration_bounds = array<i64: 2>, scalar_prefetch = 0 : i64, scratch_operands = 3 : i64, tpu.core_type = #tpu.core_type<tc>, window_params = [{pipeline_mode = #tpu.pipeline_mode<synchronous>, transform_indices = @transform_0, window_bounds = array<i64: 128, 128>}, {transform_indices = @transform_1, window_bounds = array<i64: 128, 1>}, {transform_indices = @transform_2, window_bounds = array<i64: 128, 1>}, {transform_indices = @transform_3, window_bounds = array<i64: 1, 128>}, {transform_indices = @transform_4, window_bounds = array<i64: 128, 128>}, {pipeline_mode = #tpu.pipeline_mode<synchronous>, transform_indices = @transform_5, window_bounds = array<i64: 128, 128>}, {pipeline_mode = #tpu.pipeline_mode<synchronous>, transform_indices = @transform_6, window_bounds = array<i64: 128, 128>}, {pipeline_mode = #tpu.pipeline_mode<synchronous>, transform_indices = @transform_7, window_bounds = array<i64: 128, 128>}, {pipeline_mode = #tpu.pipeline_mode<synchronous>, transform_indices = @transform_8, window_bounds = array<i64: 1, 128>}, {pipeline_mode = #tpu.pipeline_mode<synchronous>, transform_indices = @transform_9, window_bounds = array<i64: 128, 128>}, {pipeline_mode = #tpu.pipeline_mode<synchronous>, transform_indices = @transform_10, window_bounds = array<i64: 128, 128>}, {pipeline_mode = #tpu.pipeline_mode<synchronous>, transform_indices = @transform_11, window_bounds = array<i64: 1, 128>}, {pipeline_mode = #tpu.pipeline_mode<synchronous>, transform_indices = @transform_12, window_bounds = array<i64: 128, 128>}, {pipeline_mode = #tpu.pipeline_mode<synchronous>, transform_indices = @transform_13, window_bounds = array<i64: 1, 128>}, {pipeline_mode = #tpu.pipeline_mode<synchronous>, transform_indices = @transform_14, window_bounds = array<i64: 128, 128>}]} {
    %c0_i32 = arith.constant 0 : i32
    %0 = arith.cmpi eq, %arg0, %c0_i32 : i32
    %1 = arith.extui %0 : i1 to i32
    %c0_i32_0 = arith.constant 0 : i32
    %2 = arith.cmpi ne, %1, %c0_i32_0 : i32
    scf.if %2 {
      %cst_32 = arith.constant 0.000000e+00 : f32
      %53 = vector.broadcast %cst_32 : f32 to vector<128x128xf32>
      %c0_33 = arith.constant 0 : index
      %c0_34 = arith.constant 0 : index
      %54 = vector.load %arg16[%c0_33, %c0_34] : memref<128x128xf32, #tpu.memory_space<vmem>>, vector<128x128xf32>
      tpu.vector_store %arg16[%c0_33, %c0_34], %53 {strides = array<i32>} : memref<128x128xf32, #tpu.memory_space<vmem>>, vector<128x128xf32>,
      %c0_35 = arith.constant 0 : index
      %c0_36 = arith.constant 0 : index
      %55 = vector.load %arg1[%c0_35, %c0_36] : memref<128x128xf32, #tpu.memory_space<vmem>>, vector<128x128xf32>
      %c0_37 = arith.constant 0 : index
      %c0_38 = arith.constant 0 : index
      %56 = vector.load %arg6[%c0_37, %c0_38] : memref<128x128xf32, #tpu.memory_space<vmem>>, vector<128x128xf32>
      %cst_39 = arith.constant dense<0.000000e+00> : vector<128x128xf32>
      %57 = tpu.matmul %55, %56, %cst_39 {dimension_numbers = #tpu.dot_dimension_numbers<[1], [0], [0], [1], [0, 0, 1, 1], [], []>} : vector<128x128xf32>, vector<128x128xf32>, vector<128x128xf32> -> vector<128x128xf32>
      %c0_40 = arith.constant 0 : index
      %c0_41 = arith.constant 0 : index
      %58 = vector.load %arg7[%c0_40, %c0_41] : memref<128x128xf32, #tpu.memory_space<vmem>>, vector<128x128xf32>
      %cst_42 = arith.constant dense<0.000000e+00> : vector<128x128xf32>
      %59 = tpu.matmul %55, %58, %cst_42 {dimension_numbers = #tpu.dot_dimension_numbers<[1], [0], [0], [1], [0, 0, 1, 1], [], []>} : vector<128x128xf32>, vector<128x128xf32>, vector<128x128xf32> -> vector<128x128xf32>
      %60 = arith.truncf %57 : vector<128x128xf32> to vector<128x128xbf16>
      %c0_43 = arith.constant 0 : index
      %c0_44 = arith.constant 0 : index
      %61 = vector.load %arg17[%c0_43, %c0_44] : memref<128x128xbf16, #tpu.memory_space<vmem>>, vector<128x128xbf16>
      tpu.vector_store %arg17[%c0_43, %c0_44], %60 {strides = array<i32>} : memref<128x128xbf16, #tpu.memory_space<vmem>>, vector<128x128xbf16>,
      %62 = arith.truncf %59 : vector<128x128xf32> to vector<128x128xbf16>
      %c0_45 = arith.constant 0 : index
      %c0_46 = arith.constant 0 : index
      %63 = vector.load %arg18[%c0_45, %c0_46] : memref<128x128xbf16, #tpu.memory_space<vmem>>, vector<128x128xbf16>
      tpu.vector_store %arg18[%c0_45, %c0_46], %62 {strides = array<i32>} : memref<128x128xbf16, #tpu.memory_space<vmem>>, vector<128x128xbf16>,
    } else {
    }
    %3 = tpu.iota {dimensions = array<i32: 1>} : vector<128x128xi32>
    %c0 = arith.constant 0 : index
    %c0_1 = arith.constant 0 : index
    %4 = vector.load %arg2[%c0, %c0_1] : memref<128x1xi32, #tpu.memory_space<vmem>>, vector<128x1xi32>
    %5 = vector.broadcast %4 : vector<128x1xi32> to vector<128x128xi32>
    %6 = arith.cmpi eq, %3, %5 : vector<128x128xi32>
    %cst = arith.constant 1.000000e+00 : f32
    %cst_2 = arith.constant 0.000000e+00 : f32
    %7 = vector.broadcast %cst : f32 to vector<128x128xf32>
    %8 = vector.broadcast %cst_2 : f32 to vector<128x128xf32>
    %9 = arith.select %6, %7, %8 : vector<128x128xi1>, vector<128x128xf32>
    %10 = arith.truncf %9 : vector<128x128xf32> to vector<128x128xbf16>
    %c0_3 = arith.constant 0 : index
    %c0_4 = arith.constant 0 : index
    %11 = vector.load %arg3[%c0_3, %c0_4] : memref<128x1xi32, #tpu.memory_space<vmem>>, vector<128x1xi32>
    %12 = vector.broadcast %11 : vector<128x1xi32> to vector<128x128xi32>
    %13 = arith.cmpi eq, %3, %12 : vector<128x128xi32>
    %cst_5 = arith.constant 1.000000e+00 : f32
    %cst_6 = arith.constant 0.000000e+00 : f32
    %14 = vector.broadcast %cst_5 : f32 to vector<128x128xf32>
    %15 = vector.broadcast %cst_6 : f32 to vector<128x128xf32>
    %16 = arith.select %13, %14, %15 : vector<128x128xi1>, vector<128x128xf32>
    %17 = arith.truncf %16 : vector<128x128xf32> to vector<128x128xbf16>
    %c0_7 = arith.constant 0 : index
    %c0_8 = arith.constant 0 : index
    %18 = vector.load %arg17[%c0_7, %c0_8] : memref<128x128xbf16, #tpu.memory_space<vmem>>, vector<128x128xbf16>
    %cst_9 = arith.constant dense<0.000000e+00> : vector<128x128xf32>
    %19 = tpu.matmul %10, %18, %cst_9 {dimension_numbers = #tpu.dot_dimension_numbers<[1], [0], [0], [1], [0, 0, 1, 1], [], []>} : vector<128x128xbf16>, vector<128x128xbf16>, vector<128x128xf32> -> vector<128x128xf32>
    %c0_10 = arith.constant 0 : index
    %c0_11 = arith.constant 0 : index
    %20 = vector.load %arg18[%c0_10, %c0_11] : memref<128x128xbf16, #tpu.memory_space<vmem>>, vector<128x128xbf16>
    %cst_12 = arith.constant dense<0.000000e+00> : vector<128x128xf32>
    %21 = tpu.matmul %17, %20, %cst_12 {dimension_numbers = #tpu.dot_dimension_numbers<[1], [0], [0], [1], [0, 0, 1, 1], [], []>} : vector<128x128xbf16>, vector<128x128xbf16>, vector<128x128xf32> -> vector<128x128xf32>
    %c0_13 = arith.constant 0 : index
    %c0_14 = arith.constant 0 : index
    %22 = vector.load %arg5[%c0_13, %c0_14] : memref<128x128xbf16, #tpu.memory_space<vmem>>, vector<128x128xbf16>
    %c0_15 = arith.constant 0 : index
    %c0_16 = arith.constant 0 : index
    %23 = vector.load %arg8[%c0_15, %c0_16] : memref<128x128xbf16, #tpu.memory_space<vmem>>, vector<128x128xbf16>
    %cst_17 = arith.constant dense<0.000000e+00> : vector<128x128xf32>
    %24 = tpu.matmul %22, %23, %cst_17 {dimension_numbers = #tpu.dot_dimension_numbers<[1], [0], [0], [1], [0, 0, 1, 1], [], []>} : vector<128x128xbf16>, vector<128x128xbf16>, vector<128x128xf32> -> vector<128x128xf32>
    %25 = arith.addf %19, %21 : vector<128x128xf32>
    %26 = arith.addf %25, %24 : vector<128x128xf32>
    %c0_18 = arith.constant 0 : index
    %c0_19 = arith.constant 0 : index
    %27 = vector.load %arg9[%c0_18, %c0_19] : memref<1x128xf32, #tpu.memory_space<vmem>>, vector<1x128xf32>
    %28 = vector.broadcast %27 : vector<1x128xf32> to vector<128x128xf32>
    %29 = arith.addf %26, %28 : vector<128x128xf32>
    %cst_20 = arith.constant 0.000000e+00 : f32
    %30 = vector.broadcast %cst_20 : f32 to vector<128x128xf32>
    %31 = arith.maximumf %29, %30 : vector<128x128xf32>
    %32 = tpu.iota {dimensions = array<i32: 1>} : vector<128x128xi32>
    %c16_i32 = arith.constant 16 : i32
    %33 = vector.broadcast %c16_i32 : i32 to vector<128x128xi32>
    %34 = arith.cmpi eq, %32, %33 : vector<128x128xi32>
    %cst_21 = arith.constant 1.000000e+00 : f32
    %35 = vector.broadcast %cst_21 : f32 to vector<128x128xf32>
    %36 = arith.select %34, %35, %31 : vector<128x128xi1>, vector<128x128xf32>
    %37 = tpu.iota {dimensions = array<i32: 0>} : vector<128x128xi32>
    %c0_22 = arith.constant 0 : index
    %c0_23 = arith.constant 0 : index
    %38 = vector.load %arg4[%c0_22, %c0_23] : memref<1x128xi32, #tpu.memory_space<vmem>>, vector<1x128xi32>
    %39 = vector.broadcast %38 : vector<1x128xi32> to vector<128x128xi32>
    %40 = arith.cmpi eq, %37, %39 : vector<128x128xi32>
    %cst_24 = arith.constant 1.000000e+00 : f32
    %cst_25 = arith.constant 0.000000e+00 : f32
    %41 = vector.broadcast %cst_24 : f32 to vector<128x128xf32>
    %42 = vector.broadcast %cst_25 : f32 to vector<128x128xf32>
    %43 = arith.select %40, %41, %42 : vector<128x128xi1>, vector<128x128xf32>
    %44 = arith.truncf %43 : vector<128x128xf32> to vector<128x128xbf16>
    %c0_26 = arith.constant 0 : index
    %c0_27 = arith.constant 0 : index
    %45 = vector.load %arg16[%c0_26, %c0_27] : memref<128x128xf32, #tpu.memory_space<vmem>>, vector<128x128xf32>
    %46 = arith.truncf %36 : vector<128x128xf32> to vector<128x128xbf16>
    %cst_28 = arith.constant dense<0.000000e+00> : vector<128x128xf32>
    %47 = tpu.matmul %44, %46, %cst_28 {dimension_numbers = #tpu.dot_dimension_numbers<[1], [0], [0], [1], [0, 0, 1, 1], [], []>} : vector<128x128xbf16>, vector<128x128xbf16>, vector<128x128xf32> -> vector<128x128xf32>
    %48 = arith.addf %45, %47 : vector<128x128xf32>
    %c0_29 = arith.constant 0 : index
    %c0_30 = arith.constant 0 : index
    %49 = vector.load %arg16[%c0_29, %c0_30] : memref<128x128xf32, #tpu.memory_space<vmem>>, vector<128x128xf32>
    tpu.vector_store %arg16[%c0_29, %c0_30], %48 {strides = array<i32>} : memref<128x128xf32, #tpu.memory_space<vmem>>, vector<128x128xf32>,
    %c1_i32 = arith.constant 1 : i32
    %50 = arith.cmpi eq, %arg0, %c1_i32 : i32
    %51 = arith.extui %50 : i1 to i32
    %c0_i32_31 = arith.constant 0 : i32
    %52 = arith.cmpi ne, %51, %c0_i32_31 : i32
    scf.if %52 {
      %c0_32 = arith.constant 0 : index
      %c0_33 = arith.constant 0 : index
      %53 = vector.load %arg1[%c0_32, %c0_33] : memref<128x128xf32, #tpu.memory_space<vmem>>, vector<128x128xf32>
      %c0_34 = arith.constant 0 : index
      %c0_35 = arith.constant 0 : index
      %54 = vector.load %arg10[%c0_34, %c0_35] : memref<128x128xf32, #tpu.memory_space<vmem>>, vector<128x128xf32>
      %cst_36 = arith.constant dense<0.000000e+00> : vector<128x128xf32>
      %55 = tpu.matmul %53, %54, %cst_36 {dimension_numbers = #tpu.dot_dimension_numbers<[1], [0], [0], [1], [0, 0, 1, 1], [], []>} : vector<128x128xf32>, vector<128x128xf32>, vector<128x128xf32> -> vector<128x128xf32>
      %c0_37 = arith.constant 0 : index
      %c0_38 = arith.constant 0 : index
      %56 = vector.load %arg16[%c0_37, %c0_38] : memref<128x128xf32, #tpu.memory_space<vmem>>, vector<128x128xf32>
      %c0_39 = arith.constant 0 : index
      %c0_40 = arith.constant 0 : index
      %57 = vector.load %arg11[%c0_39, %c0_40] : memref<128x128xf32, #tpu.memory_space<vmem>>, vector<128x128xf32>
      %cst_41 = arith.constant dense<0.000000e+00> : vector<128x128xf32>
      %58 = tpu.matmul %56, %57, %cst_41 {dimension_numbers = #tpu.dot_dimension_numbers<[1], [0], [0], [1], [0, 0, 1, 1], [], []>} : vector<128x128xf32>, vector<128x128xf32>, vector<128x128xf32> -> vector<128x128xf32>
      %59 = arith.addf %55, %58 : vector<128x128xf32>
      %c0_42 = arith.constant 0 : index
      %c0_43 = arith.constant 0 : index
      %60 = vector.load %arg12[%c0_42, %c0_43] : memref<1x128xf32, #tpu.memory_space<vmem>>, vector<1x128xf32>
      %61 = vector.broadcast %60 : vector<1x128xf32> to vector<128x128xf32>
      %62 = arith.addf %59, %61 : vector<128x128xf32>
      %cst_44 = arith.constant 0.000000e+00 : f32
      %63 = vector.broadcast %cst_44 : f32 to vector<128x128xf32>
      %64 = arith.maximumf %62, %63 : vector<128x128xf32>
      %c0_45 = arith.constant 0 : index
      %c0_46 = arith.constant 0 : index
      %65 = vector.load %arg13[%c0_45, %c0_46] : memref<128x128xf32, #tpu.memory_space<vmem>>, vector<128x128xf32>
      %cst_47 = arith.constant dense<0.000000e+00> : vector<128x128xf32>
      %66 = tpu.matmul %64, %65, %cst_47 {dimension_numbers = #tpu.dot_dimension_numbers<[1], [0], [0], [1], [0, 0, 1, 1], [], []>} : vector<128x128xf32>, vector<128x128xf32>, vector<128x128xf32> -> vector<128x128xf32>
      %c0_48 = arith.constant 0 : index
      %c0_49 = arith.constant 0 : index
      %67 = vector.load %arg14[%c0_48, %c0_49] : memref<1x128xf32, #tpu.memory_space<vmem>>, vector<1x128xf32>
      %68 = vector.broadcast %67 : vector<1x128xf32> to vector<128x128xf32>
      %69 = arith.addf %66, %68 : vector<128x128xf32>
      %c0_50 = arith.constant 0 : index
      %c0_51 = arith.constant 0 : index
      %70 = vector.load %arg15[%c0_50, %c0_51] : memref<128x128xf32, #tpu.memory_space<vmem>>, vector<128x128xf32>
      tpu.vector_store %arg15[%c0_50, %c0_51], %69 {strides = array<i32>} : memref<128x128xf32, #tpu.memory_space<vmem>>, vector<128x128xf32>,
    } else {
    }
    return
  }
  func.func @transform_0(%arg0: i32) -> (i32, i32) {
    %c0_i32 = arith.constant 0 : i32
    %c0_i32_0 = arith.constant 0 : i32
    %c0_i32_1 = arith.constant 0 : i32
    return %c0_i32, %c0_i32_0 : i32, i32
  }
  func.func @transform_1(%arg0: i32) -> (i32, i32) {
    %c0_i32 = arith.constant 0 : i32
    %c0_i32_0 = arith.constant 0 : i32
    return %arg0, %c0_i32 : i32, i32
  }
  func.func @transform_2(%arg0: i32) -> (i32, i32) {
    %c0_i32 = arith.constant 0 : i32
    %c0_i32_0 = arith.constant 0 : i32
    return %arg0, %c0_i32 : i32, i32
  }
  func.func @transform_3(%arg0: i32) -> (i32, i32) {
    %c0_i32 = arith.constant 0 : i32
    %c0_i32_0 = arith.constant 0 : i32
    return %c0_i32, %arg0 : i32, i32
  }
  func.func @transform_4(%arg0: i32) -> (i32, i32) {
    %c0_i32 = arith.constant 0 : i32
    %c0_i32_0 = arith.constant 0 : i32
    return %arg0, %c0_i32 : i32, i32
  }
  func.func @transform_5(%arg0: i32) -> (i32, i32) {
    %c0_i32 = arith.constant 0 : i32
    %c0_i32_0 = arith.constant 0 : i32
    %c0_i32_1 = arith.constant 0 : i32
    return %c0_i32, %c0_i32_0 : i32, i32
  }
  func.func @transform_6(%arg0: i32) -> (i32, i32) {
    %c0_i32 = arith.constant 0 : i32
    %c0_i32_0 = arith.constant 0 : i32
    %c0_i32_1 = arith.constant 0 : i32
    return %c0_i32, %c0_i32_0 : i32, i32
  }
  func.func @transform_7(%arg0: i32) -> (i32, i32) {
    %c0_i32 = arith.constant 0 : i32
    %c0_i32_0 = arith.constant 0 : i32
    %c0_i32_1 = arith.constant 0 : i32
    return %c0_i32, %c0_i32_0 : i32, i32
  }
  func.func @transform_8(%arg0: i32) -> (i32, i32) {
    %c0_i32 = arith.constant 0 : i32
    %c0_i32_0 = arith.constant 0 : i32
    %c0_i32_1 = arith.constant 0 : i32
    return %c0_i32, %c0_i32_0 : i32, i32
  }
  func.func @transform_9(%arg0: i32) -> (i32, i32) {
    %c0_i32 = arith.constant 0 : i32
    %c0_i32_0 = arith.constant 0 : i32
    %c0_i32_1 = arith.constant 0 : i32
    return %c0_i32, %c0_i32_0 : i32, i32
  }
  func.func @transform_10(%arg0: i32) -> (i32, i32) {
    %c0_i32 = arith.constant 0 : i32
    %c0_i32_0 = arith.constant 0 : i32
    %c0_i32_1 = arith.constant 0 : i32
    return %c0_i32, %c0_i32_0 : i32, i32
  }
  func.func @transform_11(%arg0: i32) -> (i32, i32) {
    %c0_i32 = arith.constant 0 : i32
    %c0_i32_0 = arith.constant 0 : i32
    %c0_i32_1 = arith.constant 0 : i32
    return %c0_i32, %c0_i32_0 : i32, i32
  }
  func.func @transform_12(%arg0: i32) -> (i32, i32) {
    %c0_i32 = arith.constant 0 : i32
    %c0_i32_0 = arith.constant 0 : i32
    %c0_i32_1 = arith.constant 0 : i32
    return %c0_i32, %c0_i32_0 : i32, i32
  }
  func.func @transform_13(%arg0: i32) -> (i32, i32) {
    %c0_i32 = arith.constant 0 : i32
    %c0_i32_0 = arith.constant 0 : i32
    %c0_i32_1 = arith.constant 0 : i32
    return %c0_i32, %c0_i32_0 : i32, i32
  }
  func.func @transform_14(%arg0: i32) -> (i32, i32) {
    %c0_i32 = arith.constant 0 : i32
    %c0_i32_0 = arith.constant 0 : i32
    %c0_i32_1 = arith.constant 0 : i32
    return %c0_i32, %c0_i32_0 : i32, i32
  }
}

</mosaic_0001>

<bundles_post_ra>
// kernel: tpu_custom_call.1
= control target key start
LH: loop header
LB: loop body
LE: loop exit
PB: predicated region body
PF: predicated region fallthrough
CT: control target
= control target key end

     0   :  { %s3426_s0 = inlined_call_operand.vmem [shape: f32[128,128], index: 0, kind: input, shape index: {}]   ;;  %s3427_s1 = inlined_call_operand.vmem [shape: s32[256,1], index: 1, kind: input, shape index: {}]   ;;  %s3428_s2 = inlined_call_operand.vmem [shape: s32[256,1], index: 2, kind: input, shape index: {}]   ;;  %s3429_s3 = inlined_call_operand.vmem [shape: s32[1,256], index: 3, kind: input, shape index: {}]   ;;  %s3430_s4 = inlined_call_operand.vmem [shape: bf16[256,128], index: 4, kind: input, shape index: {}]   ;;  %s3431_s5 = inlined_call_operand.vmem [shape: f32[128,128], index: 5, kind: input, shape index: {}]   ;;  %s3432_s6 = inlined_call_operand.vmem [shape: f32[128,128], index: 6, kind: input, shape index: {}]   ;;  %s3433_s7 = inlined_call_operand.hbm [shape: bf16[128,128], index: 7, kind: input, shape index: {}]   ;;  %s3434_s8 = inlined_call_operand.vmem [shape: f32[1,128], index: 8, kind: input, shape index: {}]   ;;  %s3435_s9 = inlined_call_operand.hbm [shape: f32[128,128], index: 9, kind: input, shape index: {}]   ;;  %s3436_s10 = inlined_call_operand.hbm [shape: f32[128,128], index: 10, kind: input, shape index: {}]   ;;  %s3437_s11 = inlined_call_operand.vmem [shape: f32[1,128], index: 11, kind: input, shape index: {}]   ;;  %s3438_s12 = inlined_call_operand.hbm [shape: f32[128,128], index: 12, kind: input, shape index: {}]   ;;  %s3439_s13 = inlined_call_operand.vmem [shape: f32[1,128], index: 13, kind: input, shape index: {}]   ;;  %s3440_s14 = inlined_call_operand.hbm [shape: f32[128,128], index: 14, kind: output, shape index: {}]  }
   0x1   :  { %3442 = sst [smem:[#allocation19_spill]] %s3433_s7 }
   0x2   :  { %3443 = sst [smem:[#allocation20_spill]] %s3435_s9 }
   0x3   :  { %3444 = sst [smem:[#allocation21_spill]] %s3440_s14 }
   0x4   :  { %19 = vsyncpa [#allocation6], 0 }
   0x5   :  { %20 = vsyncpa [#allocation9], 0 }
   0x6   :  { %21 = vsyncpa [#allocation12], 0 }
   0x7   :  { %22 = vsyncpa [#allocation7], 0  ;;  %s2887_s29 = smov 0  }
   0x8 LB: > { %3445 = sst [smem:[#allocation18_spill]] %s2796_s29  ;;  %s2896_s17 = sadd.s32 4294967295, %s2796_s29   ;;  %s2796_s29 = sphi %s2887_s29, %s28_s29  }
   0x9   : > { %s3446_s9 = sld [smem:[#allocation20_spill]]  ;;  %p2149_p0 = scmp.ge.s32.totalorder %s2796_s29, 1 }
   0xa   : > { %p368_p1 = scmp.lt.s32.totalorder %s2796_s29, 3  ;;  %p2150_p2 = scmp.ne.s32.totalorder %s2896_s17, 0 }
   0xb   : > { %p2587_p3 = scmp.eq.s32.totalorder %s2896_s17, 0  ;;  %s2798_s19 = smov [#allocation8]  }
   0xc   : > { %p2902_p4 = pnand %p2149_p0, %p368_p1  ;;  %s407_s20 = sshll.u32 %s2798_s19, 4  ;;  %s408_s20 = int_to_ptr.vmem [resolvable:$true] %s407_s20 }
   0xd   : > { %s3448_s7 = sld [smem:[#allocation19_spill]]  ;;  %s2799_s25 = smov [#allocation5]  }
   0xe   : > { %p2574_p5 = pneg %p2902_p4  ;;  %s390_s26 = sshll.u32 %s2799_s25, 4  ;;  %s391_s26 = int_to_ptr.vmem [resolvable:$true] %s390_s26 }
   0xf   : > { %s405_s16 = sshll.u32 %s3446_s9, 4  ;;  %s2800_s27 = smov 128   ;;  %s406_s16 = int_to_ptr.hbm [resolvable:$true] %s405_s16 }
  0x10   : > { %p2913_p6 = pnand %p2587_p3, %p2574_p5  ;;  %s2801_s28 = smov 8  }
  0x11   : > { %s419_s19 = sshll.u32 %s3436_s10, 4  ;;  %s2802_s21 = smov 64   ;;  %s420_s19 = int_to_ptr.hbm [resolvable:$true] %s419_s19 }
  0x12   : > { %2580 = dma.hbm_to_vmem [thread:$0]  (!%p2913_p6), %s406_s16, 2048, %s408_s20, [#allocation9], %s2800_s27, %s2800_s27, %s2801_s28  }
  0x13   : > { %s388_s23 = sshll.u32 %s3448_s7, 4  ;;  %s2803_s22 = smov 4   ;;  %s389_s23 = int_to_ptr.hbm [resolvable:$true] %s388_s23 }
  0x14   : > { %2577 = dma.hbm_to_vmem [thread:$0]  (!%p2913_p6), %s389_s23, 1024, %s391_s26, [#allocation6], %s2802_s21, %s2802_s21, %s2803_s22  }
  0x15   : > { %s2804_s7 = smov [#allocation10]   ;;  %s436_s25 = sshll.u32 %s3438_s12, 4  ;;  %s437_s25 = int_to_ptr.hbm [resolvable:$true] %s436_s25 }
  0x16   : > { %s421_s9 = sshll.u32 %s2804_s7, 4  ;;  %s2805_s16 = smov [#allocation11]   ;;  %s422_s9 = int_to_ptr.vmem [resolvable:$true] %s421_s9 }
  0x17   : > { %2583 = dma.hbm_to_vmem [thread:$0]  (!%p2913_p6), %s420_s19, 2048, %s422_s9, [#allocation9], %s2800_s27, %s2800_s27, %s2801_s28  }
  0x18   : > { %s438_s20 = sshll.u32 %s2805_s16, 4  ;;  %490 = sbr.rel (%p2902_p4) target bundleno = 1343 (0x53f), region = 76  ;;  %s439_s20 = int_to_ptr.vmem [resolvable:$true] %s438_s20 }
  0x19   : > { %2586 = dma.hbm_to_vmem [thread:$0]  (!%p2913_p6), %s437_s25, 2048, %s439_s20, [#allocation12], %s2800_s27, %s2800_s27, %s2801_s28  }
  0x1d   : > { %2779 = dma.done.wait (%p2587_p3), [#allocation6], 1024  }
  0x1e   : > { %2781 = vsyncadd (%p2587_p3), [#allocation6], 4294966272 }
  0x1f   : > { %2783 = dma.done.wait (%p2587_p3), [#allocation9], 4096  }
  0x20   : > { %2785 = vsyncadd (%p2587_p3), [#allocation9], 4294963200 }
  0x21   : > { %2787 = dma.done.wait (%p2587_p3), [#allocation12], 2048  }
  0x22   : > { %2789 = vsyncadd (%p2587_p3), [#allocation12], 4294965248  ;;  %s2160_s7 = sshll.u32 %s2896_s17, 4  ;;  %p572_p7 = scmp.lt.s32.totalorder %s2896_s17, 1 }
  0x23   : > { %p561_p8 = scmp.lt.s32.totalorder %s2160_s7, 31 }
  0x24   : > { %s2948_s9 = scalar_select %p572_p7, %s2896_s17, 1 }
  0x25   : > { %s3453_s7 = smov (!%p561_p8, %s2160_s7), 31  ;;  %584 = sbr.rel (%p2150_p2) target bundleno = 267 (0x10b), region = 96 }
  0x26   : > { %s574_s18 = scalar_lea.vmem %s3429_s3, %s2948_s9  ;;  %s2161_s23 = sshll.u32 %s3453_s7, 3 }
  0x27   : > { %s2165_s24 = sshll.u32 %s3453_s7, 2  ;;  %s2957_s28 = scalar_lea.vmem %s3427_s1, %s2161_s23 }
  0x28   : > { %s2962_s19 = scalar_lea.vmem %s3428_s2, %s2161_s23  ;;  %s2967_s25 = scalar_lea.vmem %s3430_s4, %s2165_s24 }
  0x2a   : > { %v632_v0 = vld [vmem:[%s3431_s5 + $0x78] sm:$0xff]  ;;  %v631_v2 = vld [vmem:[%s3431_s5 + $0x70] sm:$0xff]  ;;  %v2806_v3 = vmov 0.0   ;;  %v630_v5 = vld [vmem:[%s3431_s5 + $0x68] sm:$0xff] }
  0x2b   : > { %v713_v1 = vld [vmem:[%s3432_s6 + $0x78] sm:$0xff]  ;;  %585 = vst [vmem:[#allocation2 + $0x30] sm:$0xff] %v2806_v3  ;;  %633 = vmatpush.msra.mxu0 %v632_v0  ;;  %2474 = vmatpush.msra.mxu2 %v632_v0  ;;  %v712_v4 = vld [vmem:[%s3432_s6 + $0x70] sm:$0xff]  ;;  %v711_v6 = vld [vmem:[%s3432_s6 + $0x68] sm:$0xff] }
  0x2c   : > { %586 = vst [vmem:[#allocation2] sm:$0xff] %v2806_v3  ;;  %714 = vmatpush.msra.mxu1 %v713_v1  ;;  %2490 = vmatpush.msra.mxu3 %v713_v1  ;;  %v629_v7 = vld [vmem:[%s3431_s5 + $0x60] sm:$0xff]  ;;  %v628_v9 = vld [vmem:[%s3431_s5 + $0x58] sm:$0xff]  ;;  %v627_v11 = vld [vmem:[%s3431_s5 + $0x50] sm:$0xff] }
  0x2d   : > { %587 = vst [vmem:[#allocation2 + $0x58] sm:$0xff] %v2806_v3  ;;  %634 = vmatpush.msra.mxu0 %v631_v2  ;;  %2475 = vmatpush.msra.mxu2 %v631_v2  ;;  %v710_v8 = vld [vmem:[%s3432_s6 + $0x60] sm:$0xff]  ;;  %v709_v10 = vld [vmem:[%s3432_s6 + $0x58] sm:$0xff]  ;;  %v708_v12 = vld [vmem:[%s3432_s6 + $0x50] sm:$0xff] }
  0x2e   : > { %588 = vst [vmem:[#allocation2 + $0x18] sm:$0xff] %v2806_v3  ;;  %715 = vmatpush.msra.mxu1 %v712_v4  ;;  %2491 = vmatpush.msra.mxu3 %v712_v4  ;;  %v626_v13 = vld [vmem:[%s3431_s5 + $0x48] sm:$0xff]  ;;  %v625_v15 = vld [vmem:[%s3431_s5 + $0x40] sm:$0xff]  ;;  %v624_v17 = vld [vmem:[%s3431_s5 + $0x38] sm:$0xff] }
  0x2f   : > { %589 = vst [vmem:[#allocation2 + $0x50] sm:$0xff] %v2806_v3  ;;  %635 = vmatpush.msra.mxu0 %v630_v5  ;;  %2476 = vmatpush.msra.mxu2 %v630_v5  ;;  %v707_v14 = vld [vmem:[%s3432_s6 + $0x48] sm:$0xff]  ;;  %v706_v16 = vld [vmem:[%s3432_s6 + $0x40] sm:$0xff]  ;;  %v705_v18 = vld [vmem:[%s3432_s6 + $0x38] sm:$0xff] }
  0x30   : > { %590 = vst [vmem:[#allocation2 + $0x68] sm:$0xff] %v2806_v3  ;;  %716 = vmatpush.msra.mxu1 %v711_v6  ;;  %2492 = vmatpush.msra.mxu3 %v711_v6  ;;  %v623_v19 = vld [vmem:[%s3431_s5 + $0x30] sm:$0xff]  ;;  %v622_v21 = vld [vmem:[%s3431_s5 + $0x28] sm:$0xff]  ;;  %v621_v23 = vld [vmem:[%s3431_s5 + $0x20] sm:$0xff] }
  0x31   : > { %591 = vst [vmem:[#allocation2 + $0x8] sm:$0xff] %v2806_v3  ;;  %636 = vmatpush.msra.mxu0 %v629_v7  ;;  %2477 = vmatpush.msra.mxu2 %v629_v7  ;;  %v704_v20 = vld [vmem:[%s3432_s6 + $0x30] sm:$0xff]  ;;  %v703_v22 = vld [vmem:[%s3432_s6 + $0x28] sm:$0xff]  ;;  %v702_v24 = vld [vmem:[%s3432_s6 + $0x20] sm:$0xff] }
  0x32   : > { %592 = vst [vmem:[#allocation2 + $0x48] sm:$0xff] %v2806_v3  ;;  %717 = vmatpush.msra.mxu1 %v710_v8  ;;  %2493 = vmatpush.msra.mxu3 %v710_v8  ;;  %v620_v25 = vld [vmem:[%s3431_s5 + $0x18] sm:$0xff]  ;;  %v619_v27 = vld [vmem:[%s3431_s5 + $0x10] sm:$0xff]  ;;  %v618_v29 = vld [vmem:[%s3431_s5 + $0x8] sm:$0xff] }
  0x33   : > { %593 = vst [vmem:[#allocation2 + $0x40] sm:$0xff] %v2806_v3  ;;  %637 = vmatpush.msra.mxu0 %v628_v9  ;;  %2478 = vmatpush.msra.mxu2 %v628_v9  ;;  %v701_v26 = vld [vmem:[%s3432_s6 + $0x18] sm:$0xff]  ;;  %v700_v28 = vld [vmem:[%s3432_s6 + $0x10] sm:$0xff]  ;;  %v699_v30 = vld [vmem:[%s3432_s6 + $0x8] sm:$0xff] }
  0x34   : > { %594 = vst [vmem:[#allocation2 + $0x20] sm:$0xff] %v2806_v3  ;;  %718 = vmatpush.msra.mxu1 %v709_v10  ;;  %2494 = vmatpush.msra.mxu3 %v709_v10  ;;  %v617_v31 = vld [vmem:[%s3431_s5] sm:$0xff]  ;;  %v602_v35 = vld [vmem:[%s3426_s0 + $0x8] sm:$0xff]  ;;  %v603_v37 = vld [vmem:[%s3426_s0 + $0x10] sm:$0xff] }
  0x35   : > { %595 = vst [vmem:[#allocation2 + $0x10] sm:$0xff] %v2806_v3  ;;  %638 = vmatpush.msra.mxu0 %v627_v11  ;;  %2479 = vmatpush.msra.mxu2 %v627_v11  ;;  %v698_v32 = vld [vmem:[%s3432_s6] sm:$0xff]  ;;  %v610_v36 = vld [vmem:[%s3426_s0 + $0x48] sm:$0xff]  ;;  %v611_v38 = vld [vmem:[%s3426_s0 + $0x50] sm:$0xff] }
  0x36   : > { %596 = vst [vmem:[#allocation2 + $0x38] sm:$0xff] %v2806_v3  ;;  %719 = vmatpush.msra.mxu1 %v708_v12  ;;  %2495 = vmatpush.msra.mxu3 %v708_v12  ;;  %v601_v33 = vld [vmem:[%s3426_s0] sm:$0xff]  ;;  %v604_v39 = vld [vmem:[%s3426_s0 + $0x18] sm:$0xff]  ;;  %v606_v43 = vld [vmem:[%s3426_s0 + $0x28] sm:$0xff] }
  0x37   : > { %597 = vst [vmem:[#allocation2 + $0x60] sm:$0xff] %v2806_v3  ;;  %639 = vmatpush.msra.mxu0 %v626_v13  ;;  %2480 = vmatpush.msra.mxu2 %v626_v13  ;;  %v609_v34 = vld [vmem:[%s3426_s0 + $0x40] sm:$0xff]  ;;  %v612_v40 = vld [vmem:[%s3426_s0 + $0x58] sm:$0xff]  ;;  %v614_v44 = vld [vmem:[%s3426_s0 + $0x68] sm:$0xff] }
  0x38   : > { %598 = vst [vmem:[#allocation2 + $0x70] sm:$0xff] %v2806_v3  ;;  %720 = vmatpush.msra.mxu1 %v707_v14  ;;  %2496 = vmatpush.msra.mxu3 %v707_v14  ;;  %v605_v41 = vld [vmem:[%s3426_s0 + $0x20] sm:$0xff]  ;;  %v607_v45 = vld [vmem:[%s3426_s0 + $0x30] sm:$0xff]  ;;  %v608_v47 = vld [vmem:[%s3426_s0 + $0x38] sm:$0xff] }
  0x39   : > { %599 = vst [vmem:[#allocation2 + $0x78] sm:$0xff] %v2806_v3  ;;  %640 = vmatpush.msra.mxu0 %v625_v15  ;;  %2481 = vmatpush.msra.mxu2 %v625_v15  ;;  %v613_v42 = vld [vmem:[%s3426_s0 + $0x60] sm:$0xff]  ;;  %v615_v46 = vld [vmem:[%s3426_s0 + $0x70] sm:$0xff]  ;;  %v616_v48 = vld [vmem:[%s3426_s0 + $0x78] sm:$0xff] }
  0x3a   : > { %600 = vst [vmem:[#allocation2 + $0x28] sm:$0xff] %v2806_v3  ;;  %721 = vmatpush.msra.mxu1 %v706_v16  ;;  %2497 = vmatpush.msra.mxu3 %v706_v16 }
  0x3b   : > { %641 = vmatpush.msra.mxu0 %v624_v17  ;;  %2482 = vmatpush.msra.mxu2 %v624_v17 }
  0x3c   : > { %722 = vmatpush.msra.mxu1 %v705_v18  ;;  %2498 = vmatpush.msra.mxu3 %v705_v18 }
  0x3d   : > { %642 = vmatpush.msra.mxu0 %v623_v19  ;;  %2483 = vmatpush.msra.mxu2 %v623_v19 }
  0x3e   : > { %723 = vmatpush.msra.mxu1 %v704_v20  ;;  %2499 = vmatpush.msra.mxu3 %v704_v20 }
  0x3f   : > { %643 = vmatpush.msra.mxu0 %v622_v21  ;;  %2484 = vmatpush.msra.mxu2 %v622_v21 }
  0x40   : > { %724 = vmatpush.msra.mxu1 %v703_v22  ;;  %2500 = vmatpush.msra.mxu3 %v703_v22 }
  0x41   : > { %644 = vmatpush.msra.mxu0 %v621_v23  ;;  %2485 = vmatpush.msra.mxu2 %v621_v23 }
  0x42   : > { %725 = vmatpush.msra.mxu1 %v702_v24  ;;  %2501 = vmatpush.msra.mxu3 %v702_v24 }
  0x43   : > { %645 = vmatpush.msra.mxu0 %v620_v25  ;;  %2486 = vmatpush.msra.mxu2 %v620_v25 }
  0x44   : > { %726 = vmatpush.msra.mxu1 %v701_v26  ;;  %2502 = vmatpush.msra.mxu3 %v701_v26 }
  0x45   : > { %646 = vmatpush.msra.mxu0 %v619_v27  ;;  %2487 = vmatpush.msra.mxu2 %v619_v27 }
  0x46   : > { %727 = vmatpush.msra.mxu1 %v700_v28  ;;  %2503 = vmatpush.msra.mxu3 %v700_v28 }
  0x47   : > { %647 = vmatpush.msra.mxu0 %v618_v29  ;;  %2488 = vmatpush.msra.mxu2 %v618_v29 }
  0x48   : > { %728 = vmatpush.msra.mxu1 %v699_v30  ;;  %2504 = vmatpush.msra.mxu3 %v699_v30 }
  0x49   : > { %648 = vmatpush.msra.mxu0 %v617_v31  ;;  %2489 = vmatpush.msra.mxu2 %v617_v31 }
  0x4a   : > { %729 = vmatpush.msra.mxu1 %v698_v32  ;;  %2505 = vmatpush.msra.mxu3 %v698_v32 }
  0x4b   : > { %649 = vmatmul.f32.vlgmr.msra.gmra.mxu0 %v601_v33  ;;  %673 = vmatmul.f32.vlgmr.msra.gmra.mxu2 %v609_v34 }
  0x4c   : > { %730 = vmatmul.f32.vlgmr.msra.gmra.mxu1 %v601_v33  ;;  %754 = vmatmul.f32.vlgmr.msra.gmra.mxu3 %v609_v34 }
  0x53   : > { %652 = vmatmul.f32.gmra.mxu0 %v602_v35  ;;  %676 = vmatmul.f32.gmra.mxu2 %v610_v36 }
  0x54   : > { %733 = vmatmul.f32.gmra.mxu1 %v602_v35  ;;  %757 = vmatmul.f32.gmra.mxu3 %v610_v36 }
  0x5b   : > { %655 = vmatmul.f32.gmra.mxu0 %v603_v37  ;;  %679 = vmatmul.f32.gmra.mxu2 %v611_v38 }
  0x5c   : > { %736 = vmatmul.f32.gmra.mxu1 %v603_v37  ;;  %760 = vmatmul.f32.gmra.mxu3 %v611_v38 }
  0x63   : > { %658 = vmatmul.f32.gmra.mxu0 %v604_v39  ;;  %682 = vmatmul.f32.gmra.mxu2 %v612_v40 }
  0x64   : > { %739 = vmatmul.f32.gmra.mxu1 %v604_v39  ;;  %763 = vmatmul.f32.gmra.mxu3 %v612_v40 }
  0x6b   : > { %661 = vmatmul.f32.gmra.mxu0 %v605_v41  ;;  %685 = vmatmul.f32.gmra.mxu2 %v613_v42 }
  0x6c   : > { %742 = vmatmul.f32.gmra.mxu1 %v605_v41  ;;  %766 = vmatmul.f32.gmra.mxu3 %v613_v42 }
  0x73   : > { %664 = vmatmul.f32.gmra.mxu0 %v606_v43  ;;  %688 = vmatmul.f32.gmra.mxu2 %v614_v44 }
  0x74   : > { %745 = vmatmul.f32.gmra.mxu1 %v606_v43  ;;  %769 = vmatmul.f32.gmra.mxu3 %v614_v44 }
  0x7b   : > { %667 = vmatmul.f32.gmra.mxu0 %v607_v45  ;;  %691 = vmatmul.f32.gmra.mxu2 %v615_v46 }
  0x7c   : > { %748 = vmatmul.f32.gmra.mxu1 %v607_v45  ;;  %772 = vmatmul.f32.gmra.mxu3 %v615_v46 }
  0x83   : > { %670 = vmatmul.f32.gmra.mxu0 %v608_v47  ;;  %694 = vmatmul.f32.gmra.mxu2 %v616_v48 }
  0x84   : > { %751 = vmatmul.f32.gmra.mxu1 %v608_v47  ;;  %775 = vmatmul.f32.gmra.mxu3 %v616_v48 }
  0xc8   : > { %v650_v49 = vpop.f32.mrf.mxu0 }
  0xc9   : > { %v731_v50 = vpop.f32.mrf.mxu1 }
  0xce   : > { %v674_v51 = vpop.f32.mrf.mxu2 }
  0xcf   : > { %v755_v52 = vpop.f32.mrf.mxu3 }
  0xd0   : > { %v653_v53 = vpop.f32.mrf.mxu0 }
  0xd1   : > { %v2383_v54 = vpack.c.bf16 %v653_v53, %v650_v49  ;;  %v734_v55 = vpop.f32.mrf.mxu1 }
  0xd2   : > { %v2423_v56 = vpack.c.bf16 %v734_v55, %v731_v50 }
  0xd3   : > { %2384 = vst [vmem:[#allocation3 + $0x28] sm:$0xff] %v2383_v54  }
  0xd4   : > { %2424 = vst [vmem:[#allocation4 + $0x30] sm:$0xff] %v2423_v56  }
  0xd6   : > { %v677_v57 = vpop.f32.mrf.mxu2 }
  0xd7   : > { %v2403_v58 = vpack.c.bf16 %v677_v57, %v674_v51  ;;  %v758_v59 = vpop.f32.mrf.mxu3 }
  0xd8   : > { %v2443_v60 = vpack.c.bf16 %v758_v59, %v755_v52  ;;  %v656_v61 = vpop.f32.mrf.mxu0 }
  0xd9   : > { %2463 = vst [vmem:[#allocation3 + $0x18] sm:$0xff] %v2403_v58   ;;  %v737_v62 = vpop.f32.mrf.mxu1 }
  0xda   : > { %2470 = vst [vmem:[#allocation4 + $0x38] sm:$0xff] %v2443_v60  }
  0xde   : > { %v680_v63 = vpop.f32.mrf.mxu2 }
  0xdf   : > { %v761_v0 = vpop.f32.mrf.mxu3 }
  0xe0   : > { %v659_v1 = vpop.f32.mrf.mxu0 }
  0xe1   : > { %v2388_v2 = vpack.c.bf16 %v659_v1, %v656_v61  ;;  %v740_v3 = vpop.f32.mrf.mxu1 }
  0xe2   : > { %v2428_v4 = vpack.c.bf16 %v740_v3, %v737_v62 }
  0xe3   : > { %2460 = vst [vmem:[#allocation3] sm:$0xff] %v2388_v2  }
  0xe4   : > { %2467 = vst [vmem:[#allocation4] sm:$0xff] %v2428_v4  }
  0xe6   : > { %v683_v5 = vpop.f32.mrf.mxu2 }
  0xe7   : > { %v2408_v6 = vpack.c.bf16 %v683_v5, %v680_v63  ;;  %v764_v7 = vpop.f32.mrf.mxu3 }
  0xe8   : > { %v2448_v8 = vpack.c.bf16 %v764_v7, %v761_v0  ;;  %v662_v9 = vpop.f32.mrf.mxu0 }
  0xe9   : > { %2464 = vst [vmem:[#allocation3 + $0x8] sm:$0xff] %v2408_v6   ;;  %v743_v10 = vpop.f32.mrf.mxu1 }
  0xea   : > { %2471 = vst [vmem:[#allocation4 + $0x18] sm:$0xff] %v2448_v8  }
  0xee   : > { %v686_v11 = vpop.f32.mrf.mxu2 }
  0xef   : > { %v767_v12 = vpop.f32.mrf.mxu3 }
  0xf0   : > { %v665_v13 = vpop.f32.mrf.mxu0 }
  0xf1   : > { %v2393_v14 = vpack.c.bf16 %v665_v13, %v662_v9  ;;  %v746_v15 = vpop.f32.mrf.mxu1 }
  0xf2   : > { %v2433_v16 = vpack.c.bf16 %v746_v15, %v743_v10 }
  0xf3   : > { %2461 = vst [vmem:[#allocation3 + $0x10] sm:$0xff] %v2393_v14  }
  0xf4   : > { %2468 = vst [vmem:[#allocation4 + $0x10] sm:$0xff] %v2433_v16  }
  0xf6   : > { %v689_v17 = vpop.f32.mrf.mxu2 }
  0xf7   : > { %v2413_v18 = vpack.c.bf16 %v689_v17, %v686_v11  ;;  %v770_v19 = vpop.f32.mrf.mxu3 }
  0xf8   : > { %v2453_v20 = vpack.c.bf16 %v770_v19, %v767_v12  ;;  %v668_v21 = vpop.f32.mrf.mxu0 }
  0xf9   : > { %2465 = vst [vmem:[#allocation3 + $0x38] sm:$0xff] %v2413_v18   ;;  %v749_v22 = vpop.f32.mrf.mxu1 }
  0xfa   : > { %2472 = vst [vmem:[#allocation4 + $0x8] sm:$0xff] %v2453_v20  }
  0xfe   : > { %v692_v23 = vpop.f32.mrf.mxu2 }
  0xff   : > { %v773_v24 = vpop.f32.mrf.mxu3 }
 0x100   : > { %v671_v25 = vpop.f32.mrf.mxu0 }
 0x101   : > { %v2398_v26 = vpack.c.bf16 %v671_v25, %v668_v21  ;;  %v752_v27 = vpop.f32.mrf.mxu1 }
 0x102   : > { %v2438_v28 = vpack.c.bf16 %v752_v27, %v749_v22 }
 0x103   : > { %2462 = vst [vmem:[#allocation3 + $0x20] sm:$0xff] %v2398_v26  }
 0x104   : > { %2469 = vst [vmem:[#allocation4 + $0x28] sm:$0xff] %v2438_v28  }
 0x106   : > { %v695_v29 = vpop.f32.mrf.mxu2 }
 0x107   : > { %v2418_v30 = vpack.c.bf16 %v695_v29, %v692_v23  ;;  %v776_v31 = vpop.f32.mrf.mxu3 }
 0x108   : > { %v2458_v32 = vpack.c.bf16 %v776_v31, %v773_v24 }
 0x109   : > { %2466 = vst [vmem:[#allocation3 + $0x30] sm:$0xff] %v2418_v30  }
 0x10a   : > { %2473 = vst [vmem:[#allocation4 + $0x20] sm:$0xff] %v2458_v32  }
 0x10b PF: > { %v949_v33 = vld [vmem:[%s2962_s19] sm:$0xff]  ;;  %v847_v34 = vld [vmem:[%s2957_s28 + $0x10] sm:$0xff]  ;;  %v2807_v36 = vmov 0   ;;  %v950_v37 = vld [vmem:[%s2962_s19 + $0x8] sm:$0xff]  ;;  %v843_v30 = vlaneseq  ;;  %p2343_p9 = scmp.ne.s32.totalorder %s2896_s17, 1 }
 0x10c   : > { %v845_v35 = vld [vmem:[%s2957_s28] sm:$0xff]  ;;  %2621 = vset.pattern.permute.xlu2 %v2807_v36  ;;  %2620 = vset.pattern.permute.xlu1 %v2807_v36  ;;  %v848_v38 = vld [vmem:[%s2957_s28 + $0x18] sm:$0xff]  ;;  %v846_v39 = vld [vmem:[%s2957_s28 + $0x8] sm:$0xff] }
 0x10d   : > { %2619 = vset.pattern.permute.xlu0 %v2807_v36  ;;  %966 = vperm.xlu1 %2620, %v949_v33   ;;  %v952_v40 = vld [vmem:[%s2962_s19 + $0x18] sm:$0xff]  ;;  %v849_v41 = vld [vmem:[%s2957_s28 + $0x20] sm:$0xff]  ;;  %v951_v42 = vld [vmem:[%s2962_s19 + $0x10] sm:$0xff]  ;;  %v3150_v31 = vand.u32 127, %v843_v30  ;;  %v2808_v36 = vmov 1.0|1.0  }
 0x10e   : > { %868 = vperm.xlu2 %2621, %v847_v34   ;;  %862 = vperm.xlu0 %2619, %v845_v35   ;;  %v953_v43 = vld [vmem:[%s2962_s19 + $0x20] sm:$0xff]  ;;  %v954_v44 = vld [vmem:[%s2962_s19 + $0x28] sm:$0xff]  ;;  %v852_v46 = vld [vmem:[%s2957_s28 + $0x38] sm:$0xff] }
 0x10f   : > { %v850_v45 = vld [vmem:[%s2957_s28 + $0x28] sm:$0xff]  ;;  %v955_v47 = vld [vmem:[%s2962_s19 + $0x30] sm:$0xff]  ;;  %v853_v49 = vld [vmem:[%s2957_s28 + $0x40] sm:$0xff] }
 0x110   : > { %v851_v48 = vld [vmem:[%s2957_s28 + $0x30] sm:$0xff]  ;;  %v854_v50 = vld [vmem:[%s2957_s28 + $0x48] sm:$0xff]  ;;  %v956_v51 = vld [vmem:[%s2962_s19 + $0x38] sm:$0xff] }
 0x111   : > { %v958_v52 = vld [vmem:[%s2962_s19 + $0x48] sm:$0xff]  ;;  %v855_v53 = vld [vmem:[%s2957_s28 + $0x50] sm:$0xff]  ;;  %v957_v54 = vld [vmem:[%s2962_s19 + $0x40] sm:$0xff] }
 0x112   : > { %v959_v55 = vld [vmem:[%s2962_s19 + $0x50] sm:$0xff]  ;;  %v960_v56 = vld [vmem:[%s2962_s19 + $0x58] sm:$0xff]  ;;  %v2363_v58 = vld [vmem:[#allocation4 + $0x20] sm:$0xff] }
 0x113   : > { %v856_v57 = vld [vmem:[%s2957_s28 + $0x58] sm:$0xff]  ;;  %v2355_v60 = vld [vmem:[#allocation3 + $0x30] sm:$0xff]  ;;  %v858_v61 = vld [vmem:[%s2957_s28 + $0x68] sm:$0xff]  ;;  %1133 = vmatpush.bf16.msra.mxu0 %v2363_v58 }
 0x114   : > { %v2379_v59 = vld [vmem:[#allocation5 + $0x38] sm:$0xff]  ;;  %v961_v62 = vld [vmem:[%s2962_s19 + $0x60] sm:$0xff]  ;;  %v2362_v0 = vld [vmem:[#allocation4 + $0x8] sm:$0xff]  ;;  %1407 = vmatpush.bf16.msra.mxu2 %v2355_v60 }
 0x115   : > { %969 = vperm.xlu1 %2620, %v950_v37   ;;  %v857_v63 = vld [vmem:[%s2957_s28 + $0x60] sm:$0xff]  ;;  %1310 = vmatpush.bf16.msra.mxu1 %v2379_v59  ;;  %v2378_v1 = vld [vmem:[#allocation5 + $0x30] sm:$0xff]  ;;  %v2354_v2 = vld [vmem:[#allocation3 + $0x38] sm:$0xff] }
 0x116   : > { %871 = vperm.xlu2 %2621, %v848_v38   ;;  %865 = vperm.xlu0 %2619, %v846_v39   ;;  %v859_v3 = vld [vmem:[%s2957_s28 + $0x70] sm:$0xff]  ;;  %v2361_v4 = vld [vmem:[#allocation4 + $0x18] sm:$0xff]  ;;  %v2377_v5 = vld [vmem:[#allocation5 + $0x28] sm:$0xff] }
 0x117   : > { %1134 = vmatpush.bf16.msra.mxu0 %v2362_v0  ;;  %v2353_v6 = vld [vmem:[#allocation3 + $0x8] sm:$0xff]  ;;  %v860_v7 = vld [vmem:[%s2957_s28 + $0x78] sm:$0xff]  ;;  %v2376_v10 = vld [vmem:[#allocation5 + $0x20] sm:$0xff] }
 0x118   : > { %1408 = vmatpush.bf16.msra.mxu2 %v2354_v2  ;;  %v962_v8 = vld [vmem:[%s2962_s19 + $0x68] sm:$0xff]  ;;  %v2360_v9 = vld [vmem:[#allocation4 + $0x38] sm:$0xff]  ;;  %v2351_v14 = vld [vmem:[#allocation3 + $0x20] sm:$0xff] }
 0x119   : > { %1311 = vmatpush.bf16.msra.mxu1 %v2378_v1  ;;  %v2352_v11 = vld [vmem:[#allocation3 + $0x18] sm:$0xff]  ;;  %v2359_v12 = vld [vmem:[#allocation4 + $0x28] sm:$0xff]  ;;  %v963_v16 = vld [vmem:[%s2962_s19 + $0x70] sm:$0xff] }
 0x11a   : > { %v2375_v13 = vld [vmem:[#allocation5 + $0x18] sm:$0xff]  ;;  %v2358_v17 = vld [vmem:[#allocation4 + $0x10] sm:$0xff]  ;;  %v2357_v20 = vld [vmem:[#allocation4] sm:$0xff] }
 0x11b   : > { %1135 = vmatpush.bf16.msra.mxu0 %v2361_v4  ;;  %v964_v15 = vld [vmem:[%s2962_s19 + $0x78] sm:$0xff]  ;;  %v2374_v18 = vld [vmem:[#allocation5 + $0x10] sm:$0xff]  ;;  %v2373_v21 = vld [vmem:[#allocation5 + $0x8] sm:$0xff] }
 0x11c   : > { %1409 = vmatpush.bf16.msra.mxu2 %v2353_v6  ;;  %v2350_v19 = vld [vmem:[#allocation3 + $0x10] sm:$0xff]  ;;  %v2349_v22 = vld [vmem:[#allocation3] sm:$0xff]  ;;  %v2348_v25 = vld [vmem:[#allocation3 + $0x28] sm:$0xff] }
 0x11d   : > { %975 = vperm.xlu1 %2620, %v952_v40   ;;  %1312 = vmatpush.bf16.msra.mxu1 %v2377_v5  ;;  %v2356_v23 = vld [vmem:[#allocation4 + $0x30] sm:$0xff]  ;;  %v2372_v24 = vld [vmem:[#allocation5] sm:$0xff]  ;;  %v2365_v27 = vld [vmem:[%s2967_s25 + $0x8] sm:$0xff] }
 0x11e   : > { %874 = vperm.xlu2 %2621, %v849_v41   ;;  %972 = vperm.xlu0 %2619, %v951_v42   ;;  %v2364_v26 = vld [vmem:[%s2967_s25] sm:$0xff]  ;;  %v2366_v35 = vld [vmem:[%s2967_s25 + $0x10] sm:$0xff]  ;;  %v2367_v40 = vld [vmem:[%s2967_s25 + $0x18] sm:$0xff] }
 0x11f   : > { %1136 = vmatpush.bf16.msra.mxu0 %v2360_v9 }
 0x120   : > { %1410 = vmatpush.bf16.msra.mxu2 %v2352_v11 }
 0x121   : > { %1313 = vmatpush.bf16.msra.mxu1 %v2376_v10 }
 0x123   : > { %1137 = vmatpush.bf16.msra.mxu0 %v2359_v12 }
 0x124   : > { %1411 = vmatpush.bf16.msra.mxu2 %v2351_v14  ;;  %v3209_v14 = vld [vmem:[%s3434_s8] ss:$0 sm:$0xff] }
 0x125   : > { %978 = vperm.xlu1 %2620, %v953_v43   ;;  %1314 = vmatpush.bf16.msra.mxu1 %v2375_v13 }
 0x126   : > { %981 = vperm.xlu2 %2621, %v954_v44   ;;  %877 = vperm.xlu0 %2619, %v850_v45  }
 0x127   : > { %1138 = vmatpush.bf16.msra.mxu0 %v2358_v17 }
 0x128   : > { %1412 = vmatpush.bf16.msra.mxu2 %v2350_v19 }
 0x129   : > { %1315 = vmatpush.bf16.msra.mxu1 %v2374_v18 }
 0x12b   : > { %1139 = vmatpush.bf16.msra.mxu0 %v2357_v20 }
 0x12c   : > { %1413 = vmatpush.bf16.msra.mxu2 %v2349_v22 }
 0x12d   : > { %883 = vperm.xlu1 %2620, %v852_v46   ;;  %1316 = vmatpush.bf16.msra.mxu1 %v2373_v21  ;;  %v2368_v46 = vld [vmem:[%s2967_s25 + $0x20] sm:$0xff] }
 0x12e   : > { %984 = vperm.xlu2 %2621, %v955_v47   ;;  %880 = vperm.xlu0 %2619, %v851_v48  }
 0x12f   : > { %1140 = vmatpush.bf16.msra.mxu0 %v2356_v23 }
 0x130   : > { %1414 = vmatpush.bf16.msra.mxu2 %v2348_v25 }
 0x131   : > { %1317 = vmatpush.bf16.msra.mxu1 %v2372_v24 }
 0x134   : > { %1318 = vmatmul.bf16.vlgmr.msra.gmra.mxu1 %v2364_v26 }
 0x135   : > { %886 = vperm.xlu1 %2620, %v853_v49  }
 0x136   : > { %889 = vperm.xlu2 %2621, %v854_v50   ;;  %987 = vperm.xlu0 %2619, %v956_v51   ;;  %v2369_v51 = vld [vmem:[%s2967_s25 + $0x28] sm:$0xff] }
 0x13d   : > { %993 = vperm.xlu1 %2620, %v958_v52  }
 0x13e   : > { %892 = vperm.xlu2 %2621, %v855_v53   ;;  %990 = vperm.xlu0 %2619, %v957_v54  }
 0x144   : > { %1323 = vmatmul.bf16.gmra.mxu1 %v2365_v27 }
 0x145   : > { %996 = vperm.xlu1 %2620, %v959_v55   ;;  %v2370_v55 = vld [vmem:[%s2967_s25 + $0x30] sm:$0xff] }
 0x146   : > { %999 = vperm.xlu2 %2621, %v960_v56   ;;  %895 = vperm.xlu0 %2619, %v856_v57  }
 0x14d   : > { %901 = vperm.xlu1 %2620, %v858_v61   ;;  %v2371_v61 = vld [vmem:[%s2967_s25 + $0x38] sm:$0xff] }
 0x14e   : > { %1002 = vperm.xlu2 %2621, %v961_v62   ;;  %898 = vperm.xlu0 %2619, %v857_v63  }
 0x154   : > { %1328 = vmatmul.bf16.gmra.mxu1 %v2366_v35 }
 0x155   : > { %904 = vperm.xlu1 %2620, %v859_v3  }
 0x156   : > { %907 = vperm.xlu2 %2621, %v860_v7   ;;  %1005 = vperm.xlu0 %2619, %v962_v8  }
 0x15d   : > { %1011 = vperm.xlu1 %2620, %v964_v15  }
 0x15e   : > { %1008 = vperm.xlu0 %2619, %v963_v16  }
 0x164   : > { %1333 = vmatmul.bf16.gmra.mxu1 %v2367_v40 }
 0x168   : > { %v869_v33 = vpop.permute.xlu2 %868 }
 0x169   : > { %vm911_vm8 = vcmp.eq.s32.totalorder %v3150_v31, %v869_v33 }
 0x170   : > { %v872_v37 = vpop.permute.xlu2 %871 }
 0x171   : > { %vm912_vm9 = vcmp.eq.s32.totalorder %v3150_v31, %v872_v37 }
 0x172   : > { %vm2313_vm11 = vmpackc.low %vm912_vm9, %vm911_vm8 }
 0x174   : > { %1338 = vmatmul.bf16.gmra.mxu1 %v2368_v46 }
 0x178   : > { %v875_v41 = vpop.permute.xlu2 %874 }
 0x179   : > { %vm913_vm15 = vcmp.eq.s32.totalorder %v3150_v31, %v875_v41 }
 0x17f   : > { %v967_v28 = vpop.permute.xlu1 %966 }
 0x180   : > { %v863_v29 = vpop.permute.xlu0 %862  ;;  %vm1013_vm0 = vcmp.eq.s32.totalorder %v3150_v31, %v967_v28  ;;  %v982_v44 = vpop.permute.xlu2 %981 }
 0x181   : > { %vm909_vm2 = vcmp.eq.s32.totalorder %v3150_v31, %v863_v29  ;;  %vm1018_vm14 = vcmp.eq.s32.totalorder %v3150_v31, %v982_v44 }
 0x184   : > { %1343 = vmatmul.bf16.gmra.mxu1 %v2369_v51 }
 0x187   : > { %v970_v32 = vpop.permute.xlu1 %969 }
 0x188   : > { %vm1014_vm1 = vcmp.eq.s32.totalorder %v3150_v31, %v970_v32  ;;  %v866_v34 = vpop.permute.xlu0 %865  ;;  %v985_v49 = vpop.permute.xlu2 %984 }
 0x189   : > { %vm2199_vm3 = vmpackc.low %vm1014_vm1, %vm1013_vm0  ;;  %vm910_vm4 = vcmp.eq.s32.totalorder %v3150_v31, %v866_v34 }
 0x18a   : > { %vm2311_vm5 = vmpackc.low %vm910_vm4, %vm909_vm2  ;;  %2200 = vmatmul.msk.bf16.vlgmr.msra.gmra.mxu0 %vm2199_vm3, %v2808_v36 }
 0x18b   : > { %2312 = vmatmul.msk.bf16.vlgmr.msra.gmra.mxu2 %vm2311_vm5, %v2808_v36  ;;  %vm1019_vm5 = vcmp.eq.s32.totalorder %v3150_v31, %v985_v49 }
 0x18f   : > { %v976_v38 = vpop.permute.xlu1 %975 }
 0x190   : > { %v973_v39 = vpop.permute.xlu0 %972  ;;  %vm1016_vm6 = vcmp.eq.s32.totalorder %v3150_v31, %v976_v38  ;;  %v890_v52 = vpop.permute.xlu2 %889 }
 0x191   : > { %vm1015_vm7 = vcmp.eq.s32.totalorder %v3150_v31, %v973_v39 }
 0x192   : > { %vm2201_vm10 = vmpackc.low %vm1016_vm6, %vm1015_vm7 }
 0x194   : > { %1348 = vmatmul.bf16.gmra.mxu1 %v2370_v55 }
 0x197   : > { %v979_v43 = vpop.permute.xlu1 %978 }
 0x198   : > { %v878_v42 = vpop.permute.xlu0 %877  ;;  %vm1017_vm12 = vcmp.eq.s32.totalorder %v3150_v31, %v979_v43  ;;  %v893_v56 = vpop.permute.xlu2 %892 }
 0x199   : > { %vm914_vm13 = vcmp.eq.s32.totalorder %v3150_v31, %v878_v42  ;;  %vm2203_vm0 = vmpackc.low %vm1018_vm14, %vm1017_vm12 }
 0x19a   : > { %2202 = vmatmul.msk.bf16.gmra.mxu0 %vm2201_vm10, %v2808_v36  ;;  %vm2315_vm1 = vmpackc.low %vm914_vm13, %vm913_vm15 }
 0x19b   : > { %2314 = vmatmul.msk.bf16.gmra.mxu2 %vm2313_vm11, %v2808_v36  ;;  %vm918_vm11 = vcmp.eq.s32.totalorder %v3150_v31, %v890_v52 }
 0x19f   : > { %v884_v47 = vpop.permute.xlu1 %883 }
 0x1a0   : > { %v881_v45 = vpop.permute.xlu0 %880  ;;  %vm916_vm3 = vcmp.eq.s32.totalorder %v3150_v31, %v884_v47  ;;  %v1000_v59 = vpop.permute.xlu2 %999 }
 0x1a1   : > { %vm915_vm4 = vcmp.eq.s32.totalorder %v3150_v31, %v881_v45 }
 0x1a2   : > { %vm2317_vm7 = vmpackc.low %vm916_vm3, %vm915_vm4 }
 0x1a4   : > { %1353 = vmatmul.bf16.gmra.mxu1 %v2371_v61 }
 0x1a7   : > { %v887_v50 = vpop.permute.xlu1 %886 }
 0x1a8   : > { %v988_v48 = vpop.permute.xlu0 %987  ;;  %vm917_vm10 = vcmp.eq.s32.totalorder %v3150_v31, %v887_v50  ;;  %v1003_v0 = vpop.permute.xlu2 %1002 }
 0x1a9   : > { %vm1020_vm2 = vcmp.eq.s32.totalorder %v3150_v31, %v988_v48  ;;  %vm2319_vm13 = vmpackc.low %vm918_vm11, %vm917_vm10 }
 0x1aa   : > { %2204 = vmatmul.msk.bf16.gmra.mxu0 %vm2203_vm0, %v2808_v36  ;;  %vm2205_vm6 = vmpackc.low %vm1020_vm2, %vm1019_vm5  ;;  %vm1024_vm0 = vcmp.eq.s32.totalorder %v3150_v31, %v1000_v59 }
 0x1ab   : > { %2316 = vmatmul.msk.bf16.gmra.mxu2 %vm2315_vm1, %v2808_v36  ;;  %vm919_vm1 = vcmp.eq.s32.totalorder %v3150_v31, %v893_v56 }
 0x1af   : > { %v994_v53 = vpop.permute.xlu1 %993 }
 0x1b0   : > { %v991_v54 = vpop.permute.xlu0 %990  ;;  %vm1022_vm8 = vcmp.eq.s32.totalorder %v3150_v31, %v994_v53  ;;  %v908_v5 = vpop.permute.xlu2 %907 }
 0x1b1   : > { %vm1021_vm9 = vcmp.eq.s32.totalorder %v3150_v31, %v991_v54  ;;  %v1319_v2 = vpop.f32.mrf.mxu1 }
 0x1b2   : > { %vm2207_vm12 = vmpackc.low %vm1022_vm8, %vm1021_vm9 }
 0x1b7   : > { %v997_v58 = vpop.permute.xlu1 %996 }
 0x1b8   : > { %v896_v57 = vpop.permute.xlu0 %895  ;;  %vm1023_vm14 = vcmp.eq.s32.totalorder %v3150_v31, %v997_v58 }
 0x1b9   : > { %vm920_vm15 = vcmp.eq.s32.totalorder %v3150_v31, %v896_v57  ;;  %vm2209_vm2 = vmpackc.low %vm1024_vm0, %vm1023_vm14  ;;  %v1321_v6 = vpop.f32.mrf.mxu1  ;;  %vm1508_vm0 = vcmp.eq.s32.totalorder %v3150_v31, 16 }
 0x1ba   : > { %2206 = vmatmul.msk.bf16.gmra.mxu0 %vm2205_vm6, %v2808_v36  ;;  %vm2321_vm3 = vmpackc.low %vm920_vm15, %vm919_vm1 }
 0x1bb   : > { %2318 = vmatmul.msk.bf16.gmra.mxu2 %vm2317_vm7, %v2808_v36  ;;  %vm1025_vm7 = vcmp.eq.s32.totalorder %v3150_v31, %v1003_v0 }
 0x1bf   : > { %v902_v62 = vpop.permute.xlu1 %901 }
 0x1c0   : > { %v899_v60 = vpop.permute.xlu0 %898  ;;  %vm922_vm5 = vcmp.eq.s32.totalorder %v3150_v31, %v902_v62 }
 0x1c1   : > { %vm921_vm6 = vcmp.eq.s32.totalorder %v3150_v31, %v899_v60  ;;  %v1324_v7 = vpop.f32.mrf.mxu1 }
 0x1c2   : > { %vm2323_vm9 = vmpackc.low %vm922_vm5, %vm921_vm6 }
 0x1c7   : > { %v905_v1 = vpop.permute.xlu1 %904 }
 0x1c8   : > { %v1006_v63 = vpop.permute.xlu0 %1005 }
 0x1c9   : > { %vm1026_vm4 = vcmp.eq.s32.totalorder %v3150_v31, %v1006_v63  ;;  %v1326_v12 = vpop.f32.mrf.mxu1 }
 0x1ca   : > { %2208 = vmatmul.msk.bf16.gmra.mxu0 %vm2207_vm12, %v2808_v36  ;;  %vm2211_vm8 = vmpackc.low %vm1026_vm4, %vm1025_vm7  ;;  %vm923_vm12 = vcmp.eq.s32.totalorder %v3150_v31, %v905_v1 }
 0x1cb   : > { %2320 = vmatmul.msk.bf16.gmra.mxu2 %vm2319_vm13, %v2808_v36  ;;  %vm924_vm13 = vcmp.eq.s32.totalorder %v3150_v31, %v908_v5 }
 0x1cc   : > { %vm2325_vm15 = vmpackc.low %vm924_vm13, %vm923_vm12 }
 0x1cf   : > { %v1012_v3 = vpop.permute.xlu1 %1011 }
 0x1d0   : > { %v1009_v4 = vpop.permute.xlu0 %1008  ;;  %vm1028_vm10 = vcmp.eq.s32.totalorder %v3150_v31, %v1012_v3 }
 0x1d1   : > { %vm1027_vm11 = vcmp.eq.s32.totalorder %v3150_v31, %v1009_v4  ;;  %v1329_v20 = vpop.f32.mrf.mxu1 }
 0x1d2   : > { %vm2213_vm14 = vmpackc.low %vm1028_vm10, %vm1027_vm11 }
 0x1d9   : > { %v1331_v33 = vpop.f32.mrf.mxu1 }
 0x1da   : > { %2210 = vmatmul.msk.bf16.gmra.mxu0 %vm2209_vm2, %v2808_v36 }
 0x1db   : > { %2322 = vmatmul.msk.bf16.gmra.mxu2 %vm2321_vm3, %v2808_v36 }
 0x1e1   : > { %v1334_v44 = vpop.f32.mrf.mxu1 }
 0x1e9   : > { %v1336_v55 = vpop.f32.mrf.mxu1 }
 0x1ea   : > { %2212 = vmatmul.msk.bf16.gmra.mxu0 %vm2211_vm8, %v2808_v36 }
 0x1eb   : > { %2324 = vmatmul.msk.bf16.gmra.mxu2 %vm2323_vm9, %v2808_v36 }
 0x1f1   : > { %v1339_v3 = vpop.f32.mrf.mxu1 }
 0x1fa   : > { %2214 = vmatmul.msk.bf16.gmra.mxu0 %vm2213_vm14, %v2808_v36 }
 0x1fb   : > { %2326 = vmatmul.msk.bf16.gmra.mxu2 %vm2325_vm15, %v2808_v36 }
 0x207   : > { %v1142_v8 = vpop.f32.mrf.mxu0 }
 0x20e   : > { %v1416_v9 = vpop.f32.mrf.mxu2 }
 0x20f   : > { %v1417_v10 = vadd.f32 %v1416_v9, %v1142_v8  ;;  %v1144_v11 = vpop.f32.mrf.mxu0 }
 0x211   : > { %v1456_v13 = vadd.f32 %v1417_v10, %v1319_v2 }
 0x213   : > { %v1476_v16 = vadd.f32 %v3209_v14, %v1456_v13 }
 0x215   : > { %v1492_v22 = vmax.f32 %v1476_v16, 0.0 }
 0x216   : > { %v1418_v15 = vpop.f32.mrf.mxu2 }
 0x217   : > { %v1419_v17 = vadd.f32 %v1418_v15, %v1144_v11  ;;  %v1147_v18 = vpop.f32.mrf.mxu0  ;;  %v3216_v27 = vsel %vm1508_vm0, 1.0, %v1492_v22  ;;  %v1341_v11 = vpop.f32.mrf.mxu1 }
 0x219   : > { %v1457_v19 = vadd.f32 %v1419_v17, %v1321_v6 }
 0x21b   : > { %v1477_v21 = vadd.f32 %v3209_v14, %v1457_v19 }
 0x21d   : > { %v1493_v23 = vmax.f32 %v1477_v21, 0.0 }
 0x21e   : > { %v1421_v24 = vpop.f32.mrf.mxu2 }
 0x21f   : > { %v1422_v25 = vadd.f32 %v1421_v24, %v1147_v18  ;;  %v1149_v26 = vpop.f32.mrf.mxu0  ;;  %v3220_v28 = vsel %vm1508_vm0, 1.0, %v1493_v23  ;;  %v1344_v22 = vpop.f32.mrf.mxu1 }
 0x220   : > { %v1600_v29 = vpack.c.bf16 %v3220_v28, %v3216_v27 }
 0x221   : > { %v1458_v32 = vadd.f32 %v1422_v25, %v1324_v7 }
 0x223   : > { %v1478_v35 = vadd.f32 %v3209_v14, %v1458_v32 }
 0x225   : > { %v1494_v41 = vmax.f32 %v1478_v35, 0.0 }
 0x226   : > { %v1423_v34 = vpop.f32.mrf.mxu2 }
 0x227   : > { %v1424_v37 = vadd.f32 %v1423_v34, %v1149_v26  ;;  %v1152_v38 = vpop.f32.mrf.mxu0  ;;  %v3228_v47 = vsel %vm1508_vm0, 1.0, %v1494_v41  ;;  %v1346_v26 = vpop.f32.mrf.mxu1 }
 0x229   : > { %v1459_v39 = vadd.f32 %v1424_v37, %v1326_v12 }
 0x22b   : > { %v1479_v40 = vadd.f32 %v3209_v14, %v1459_v39 }
 0x22d   : > { %v1495_v42 = vmax.f32 %v1479_v40, 0.0 }
 0x22e   : > { %v1426_v43 = vpop.f32.mrf.mxu2 }
 0x22f   : > { %v1427_v45 = vadd.f32 %v1426_v43, %v1152_v38  ;;  %v1154_v46 = vpop.f32.mrf.mxu0  ;;  %v3232_v48 = vsel %vm1508_vm0, 1.0, %v1495_v42  ;;  %v1349_v34 = vpop.f32.mrf.mxu1 }
 0x230   : > { %v1601_v49 = vpack.c.bf16 %v3232_v48, %v3228_v47 }
 0x231   : > { %v1460_v50 = vadd.f32 %v1427_v45, %v1329_v20 }
 0x233   : > { %v1480_v52 = vadd.f32 %v3209_v14, %v1460_v50 }
 0x235   : > { %v1496_v58 = vmax.f32 %v1480_v52, 0.0 }
 0x236   : > { %v1428_v51 = vpop.f32.mrf.mxu2 }
 0x237   : > { %v1429_v53 = vadd.f32 %v1428_v51, %v1154_v46  ;;  %v1157_v54 = vpop.f32.mrf.mxu0  ;;  %v3240_v63 = vsel %vm1508_vm0, 1.0, %v1496_v58  ;;  %v1351_v38 = vpop.f32.mrf.mxu1 }
 0x239   : > { %v1461_v56 = vadd.f32 %v1429_v53, %v1331_v33 }
 0x23b   : > { %v1481_v57 = vadd.f32 %v3209_v14, %v1461_v56 }
 0x23d   : > { %v1497_v59 = vmax.f32 %v1481_v57, 0.0 }
 0x23e   : > { %v1431_v60 = vpop.f32.mrf.mxu2 }
 0x23f   : > { %v1432_v61 = vadd.f32 %v1431_v60, %v1157_v54  ;;  %v1159_v62 = vpop.f32.mrf.mxu0  ;;  %v3244_v0 = vsel %vm1508_vm0, 1.0, %v1497_v59  ;;  %v1354_v41 = vpop.f32.mrf.mxu1 }
 0x240   : > { %v1602_v1 = vpack.c.bf16 %v3244_v0, %v3240_v63 }
 0x241   : > { %v1462_v2 = vadd.f32 %v1432_v61, %v1334_v44 }
 0x243   : > { %v1482_v5 = vadd.f32 %v3209_v14, %v1462_v2 }
 0x245   : > { %v1498_v10 = vmax.f32 %v1482_v5, 0.0 }
 0x246   : > { %v1433_v4 = vpop.f32.mrf.mxu2 }
 0x247   : > { %v1434_v6 = vadd.f32 %v1433_v4, %v1159_v62  ;;  %v1162_v7 = vpop.f32.mrf.mxu0  ;;  %v3252_v17 = vsel %vm1508_vm0, 1.0, %v1498_v10  ;;  %v1356_v58 = vpop.f32.mrf.mxu1 }
 0x249   : > { %v1463_v8 = vadd.f32 %v1434_v6, %v1336_v55 }
 0x24b   : > { %v1483_v9 = vadd.f32 %v3209_v14, %v1463_v8 }
 0x24d   : > { %v1499_v12 = vmax.f32 %v1483_v9, 0.0 }
 0x24e   : > { %v1436_v13 = vpop.f32.mrf.mxu2 }
 0x24f   : > { %v1437_v15 = vadd.f32 %v1436_v13, %v1162_v7  ;;  %v1164_v16 = vpop.f32.mrf.mxu0  ;;  %v3256_v18 = vsel %vm1508_vm0, 1.0, %v1499_v12 }
 0x250   : > { %v1603_v19 = vpack.c.bf16 %v3256_v18, %v3252_v17 }
 0x251   : > { %v1464_v20 = vadd.f32 %v1437_v15, %v1339_v3 }
 0x256   : > { %v1438_v21 = vpop.f32.mrf.mxu2 }
 0x257   : > { %v1167_v23 = vpop.f32.mrf.mxu0  ;;  %v1439_v59 = vadd.f32 %v1438_v21, %v1164_v16 }
 0x259   : > { %v1465_v6 = vadd.f32 %v1439_v59, %v1341_v11 }
 0x25b   : > { %v1485_v21 = vadd.f32 %v3209_v14, %v1465_v6 }
 0x25e   : > { %v1441_v24 = vpop.f32.mrf.mxu2 }
 0x25f   : > { %v1169_v25 = vpop.f32.mrf.mxu0  ;;  %v1442_v54 = vadd.f32 %v1441_v24, %v1167_v23  ;;  %v1484_v23 = vadd.f32 %v3209_v14, %v1464_v20 }
 0x261   : > { %v1466_v2 = vadd.f32 %v1442_v54, %v1344_v22  ;;  %v1587_v54 = vld [vmem:[#allocation2 + $0x18] sm:$0xff] }
 0x263   : > { %v1486_v10 = vadd.f32 %v3209_v14, %v1466_v2 }
 0x266   : > { %v1443_v32 = vpop.f32.mrf.mxu2 }
 0x267   : > { %v1172_v33 = vpop.f32.mrf.mxu0  ;;  %v1444_v50 = vadd.f32 %v1443_v32, %v1169_v25  ;;  %v1502_v25 = vmax.f32 %v1486_v10, 0.0  ;;  %v1593_v10 = vld [vmem:[#allocation2 + $0x20] sm:$0xff] }
 0x269   : > { %v1467_v60 = vadd.f32 %v1444_v50, %v1346_v26 }
 0x26b   : > { %v1487_v7 = vadd.f32 %v3209_v14, %v1467_v60 }
 0x26d   : > { %v1503_v11 = vmax.f32 %v1487_v7, 0.0  ;;  %v1592_v7 = vld [vmem:[#allocation2 + $0x40] sm:$0xff] }
 0x26e   : > { %v1446_v35 = vpop.f32.mrf.mxu2 }
 0x26f   : > { %v1174_v37 = vpop.f32.mrf.mxu0  ;;  %v1447_v45 = vadd.f32 %v1446_v35, %v1172_v33  ;;  %v1520_v32 = vsel %vm1508_vm0, 1.0, %v1503_v11  ;;  %v1501_v33 = vmax.f32 %v1485_v21, 0.0  ;;  %v1500_v35 = vmax.f32 %v1484_v23, 0.0 }
 0x271   : > { %v1468_v55 = vadd.f32 %v1447_v45, %v1349_v34  ;;  %v1519_v34 = vsel %vm1508_vm0, 1.0, %v1502_v25  ;;  %v1585_v45 = vld [vmem:[#allocation2] sm:$0xff] }
 0x273   : > { %v1488_v3 = vadd.f32 %v3209_v14, %v1468_v55 }
 0x275   : > { %v1504_v15 = vmax.f32 %v1488_v3, 0.0 }
 0x276   : > { %v1448_v39 = vpop.f32.mrf.mxu2 }
 0x277   : > { %v1177_v40 = vpop.f32.mrf.mxu0  ;;  %v1449_v44 = vadd.f32 %v1448_v39, %v1174_v37  ;;  %v1521_v24 = vsel %vm1508_vm0, 1.0, %v1504_v15  ;;  %v1605_v37 = vpack.c.bf16 %v1520_v32, %v1519_v34  ;;  %v1526_v39 = vshrl.u32 %v843_v30, 7  ;;  %v1594_v15 = vld [vmem:[#allocation2 + $0x10] sm:$0xff] }
 0x278   : > { %v1597_v32 = vld [vmem:[#allocation2 + $0x70] sm:$0xff] }
 0x279   : > { %v1469_v51 = vadd.f32 %v1449_v44, %v1351_v38  ;;  %v1518_v38 = vsel %vm1508_vm0, 1.0, %v1501_v33  ;;  %v1528_v30 = vadd.s32 16, %v1526_v39  ;;  %v1529_v31 = vadd.s32 24, %v1526_v39 }
 0x27a   : > { %v1530_v63 = vadd.s32 32, %v1526_v39  ;;  %v1531_v0 = vadd.s32 40, %v1526_v39  ;;  %v1532_v47 = vadd.s32 48, %v1526_v39  ;;  %v1533_v27 = vadd.s32 56, %v1526_v39 }
 0x27b   : > { %v1489_v61 = vadd.f32 %v3209_v14, %v1469_v51  ;;  %v1534_v28 = vadd.s32 64, %v1526_v39  ;;  %v1536_v48 = vadd.s32 80, %v1526_v39  ;;  %v1539_v17 = vadd.s32 104, %v1526_v39  ;;  %v1586_v51 = vld [vmem:[#allocation2 + $0x58] sm:$0xff] }
 0x27c   : > { %v1540_v18 = vadd.s32 112, %v1526_v39 }
 0x27d   : > { %v1505_v9 = vmax.f32 %v1489_v61, 0.0 }
 0x27e   : > { %v1451_v42 = vpop.f32.mrf.mxu2 }
 0x27f   : > { %v1452_v43 = vadd.f32 %v1451_v42, %v1177_v40  ;;  %v1179_v52 = vpop.f32.mrf.mxu0  ;;  %v1522_v22 = vsel %vm1508_vm0, 1.0, %v1505_v9  ;;  %v1527_v40 = vadd.s32 8, %v1526_v39  ;;  %v1584_v42 = vld [vmem:[#allocation2 + $0x30] sm:$0xff] }
 0x280   : > { %v1606_v26 = vpack.c.bf16 %v1522_v22, %v1521_v24  ;;  %v1595_v22 = vld [vmem:[#allocation2 + $0x38] sm:$0xff]  ;;  %v1596_v24 = vld [vmem:[#allocation2 + $0x60] sm:$0xff] }
 0x281   : > { %v1470_v46 = vadd.f32 %v1452_v43, %v1354_v41  ;;  %v2623_v41 = vld [vmem:[%s574_s18] ss:$0 sm:$0xff] }
 0x282   : > { %vm1544_vm1 = vcmp.eq.s32.totalorder %v1526_v39, %v2623_v41  ;;  %vm1545_vm2 = vcmp.eq.s32.totalorder %v1527_v40, %v2623_v41  ;;  %vm1546_vm4 = vcmp.eq.s32.totalorder %v1528_v30, %v2623_v41  ;;  %vm1547_vm5 = vcmp.eq.s32.totalorder %v1529_v31, %v2623_v41 }
 0x283   : > { %v1490_v57 = vadd.f32 %v3209_v14, %v1470_v46  ;;  %vm2327_vm3 = vmpackc.low %vm1545_vm2, %vm1544_vm1  ;;  %vm1548_vm7 = vcmp.eq.s32.totalorder %v1530_v63, %v2623_v41  ;;  %vm1549_vm8 = vcmp.eq.s32.totalorder %v1531_v0, %v2623_v41  ;;  %vm1550_vm10 = vcmp.eq.s32.totalorder %v1532_v47, %v2623_v41 }
 0x284   : > { %vm2329_vm6 = vmpackc.low %vm1547_vm5, %vm1546_vm4  ;;  %vm1551_vm11 = vcmp.eq.s32.totalorder %v1533_v27, %v2623_v41  ;;  %vm1552_vm13 = vcmp.eq.s32.totalorder %v1534_v28, %v2623_v41  ;;  %vm1557_vm4 = vcmp.eq.s32.totalorder %v1539_v17, %v2623_v41 }
 0x285   : > { %v1506_v5 = vmax.f32 %v1490_v57, 0.0  ;;  %vm2331_vm9 = vmpackc.low %vm1549_vm8, %vm1548_vm7  ;;  %v1588_v57 = vld [vmem:[#allocation2 + $0x50] sm:$0xff] }
 0x286   : > { %v1453_v53 = vpop.f32.mrf.mxu2  ;;  %vm2333_vm12 = vmpackc.low %vm1551_vm11, %vm1550_vm10 }
 0x287   : > { %v1454_v56 = vadd.f32 %v1453_v53, %v1179_v52  ;;  %v1523_v12 = vsel %vm1508_vm0, 1.0, %v1506_v5 }
 0x289   : > { %v1471_v62 = vadd.f32 %v1454_v56, %v1356_v58 }
 0x28b   : > { %v1491_v4 = vadd.f32 %v3209_v14, %v1471_v62  ;;  %v1517_v14 = vsel %vm1508_vm0, 1.0, %v1500_v35  ;;  %v1590_v62 = vld [vmem:[#allocation2 + $0x8] sm:$0xff]  ;;  %v1598_v35 = vld [vmem:[#allocation2 + $0x78] sm:$0xff] }
 0x28c   : > { %v1604_v20 = vpack.c.bf16 %v1518_v38, %v1517_v14  ;;  %v1599_v14 = vld [vmem:[#allocation2 + $0x28] sm:$0xff] }
 0x28d   : > { %v1507_v8 = vmax.f32 %v1491_v4, 0.0  ;;  %v1591_v4 = vld [vmem:[#allocation2 + $0x48] sm:$0xff] }
 0x28f   : > { %v1524_v13 = vsel %vm1508_vm0, 1.0, %v1507_v8  ;;  %vm1554_vm0 = vcmp.eq.s32.totalorder %v1536_v48, %v2623_v41 }
 0x290   : > { %v1607_v16 = vpack.c.bf16 %v1524_v13, %v1523_v12 }
 0x292   : > { %1608 = vmatpush.bf16.msra.mxu3 %v1607_v16 }
 0x296   : > { %1609 = vmatpush.bf16.msra.mxu3 %v1606_v26 }
 0x29a   : > { %1610 = vmatpush.bf16.msra.mxu3 %v1605_v37 }
 0x29e   : > { %1611 = vmatpush.bf16.msra.mxu3 %v1604_v20 }
 0x2a2   : > { %1612 = vmatpush.bf16.msra.mxu3 %v1603_v19  ;;  %v1541_v19 = vadd.s32 120, %v1526_v39 }
 0x2a4   : > { %vm1559_vm7 = vcmp.eq.s32.totalorder %v1541_v19, %v2623_v41 }
 0x2a6   : > { %1613 = vmatpush.bf16.msra.mxu3 %v1602_v1  ;;  %v1538_v1 = vadd.s32 96, %v1526_v39 }
 0x2aa   : > { %1614 = vmatpush.bf16.msra.mxu3 %v1601_v49  ;;  %v1537_v49 = vadd.s32 88, %v1526_v39 }
 0x2ac   : > { %vm1555_vm1 = vcmp.eq.s32.totalorder %v1537_v49, %v2623_v41 }
 0x2ad   : > { %vm2337_vm2 = vmpackc.low %vm1555_vm1, %vm1554_vm0 }
 0x2ae   : > { %1615 = vmatpush.bf16.msra.mxu3 %v1600_v29  ;;  %v1535_v29 = vadd.s32 72, %v1526_v39 }
 0x2b0   : > { %vm1553_vm14 = vcmp.eq.s32.totalorder %v1535_v29, %v2623_v41 }
 0x2b1   : > { %2328 = vmatmul.msk.bf16.vlgmr.msra.gmra.mxu3 %vm2327_vm3, %v2808_v36  ;;  %vm2335_vm15 = vmpackc.low %vm1553_vm14, %vm1552_vm13  ;;  %vm1556_vm3 = vcmp.eq.s32.totalorder %v1538_v1, %v2623_v41 }
 0x2b2   : > { %vm2339_vm5 = vmpackc.low %vm1557_vm4, %vm1556_vm3 }
 0x2c1   : > { %2330 = vmatmul.msk.bf16.gmra.mxu3 %vm2329_vm6, %v2808_v36  ;;  %vm1558_vm6 = vcmp.eq.s32.totalorder %v1540_v18, %v2623_v41 }
 0x2c2   : > { %vm2341_vm8 = vmpackc.low %vm1559_vm7, %vm1558_vm6 }
 0x2d1   : > { %2332 = vmatmul.msk.bf16.gmra.mxu3 %vm2331_vm9, %v2808_v36 }
 0x2e1   : > { %2334 = vmatmul.msk.bf16.gmra.mxu3 %vm2333_vm12, %v2808_v36 }
 0x2f1   : > { %2336 = vmatmul.msk.bf16.gmra.mxu3 %vm2335_vm15, %v2808_v36 }
 0x301   : > { %2338 = vmatmul.msk.bf16.gmra.mxu3 %vm2337_vm2, %v2808_v36 }
 0x311   : > { %2340 = vmatmul.msk.bf16.gmra.mxu3 %vm2339_vm5, %v2808_v36 }
 0x321   : > { %2342 = vmatmul.msk.bf16.gmra.mxu3 %vm2341_vm8, %v2808_v36  ;;  %v1589_v36 = vld [vmem:[#allocation2 + $0x68] sm:$0xff] }
 0x334   : > { %v1617_v43 = vpop.f32.mrf.mxu3 }
 0x335   : > { %v1657_v44 = vadd.f32 %v1617_v43, %v1584_v42 }
 0x337   : > { %1673 = vst [vmem:[#allocation2 + $0x30] sm:$0xff] %v1657_v44 }
 0x33c   : > { %v1619_v46 = vpop.f32.mrf.mxu3 }
 0x33d   : > { %v1658_v50 = vadd.f32 %v1619_v46, %v1585_v45 }
 0x33f   : > { %1674 = vst [vmem:[#allocation2] sm:$0xff] %v1658_v50 }
 0x344   : > { %v1622_v52 = vpop.f32.mrf.mxu3 }
 0x345   : > { %v1659_v53 = vadd.f32 %v1622_v52, %v1586_v51 }
 0x347   : > { %1675 = vst [vmem:[#allocation2 + $0x58] sm:$0xff] %v1659_v53 }
 0x34c   : > { %v1624_v55 = vpop.f32.mrf.mxu3 }
 0x34d   : > { %v1660_v56 = vadd.f32 %v1624_v55, %v1587_v54 }
 0x34f   : > { %1676 = vst [vmem:[#allocation2 + $0x18] sm:$0xff] %v1660_v56 }
 0x354   : > { %v1627_v58 = vpop.f32.mrf.mxu3 }
 0x355   : > { %v1661_v59 = vadd.f32 %v1627_v58, %v1588_v57 }
 0x357   : > { %1677 = vst [vmem:[#allocation2 + $0x50] sm:$0xff] %v1661_v59 }
 0x35c   : > { %v1629_v60 = vpop.f32.mrf.mxu3 }
 0x35d   : > { %v1662_v61 = vadd.f32 %v1629_v60, %v1589_v36 }
 0x35f   : > { %1678 = vst [vmem:[#allocation2 + $0x68] sm:$0xff] %v1662_v61 }
 0x364   : > { %v1632_v2 = vpop.f32.mrf.mxu3 }
 0x365   : > { %v1663_v3 = vadd.f32 %v1632_v2, %v1590_v62 }
 0x367   : > { %1679 = vst [vmem:[#allocation2 + $0x8] sm:$0xff] %v1663_v3 }
 0x36c   : > { %v1634_v5 = vpop.f32.mrf.mxu3 }
 0x36d   : > { %v1664_v6 = vadd.f32 %v1634_v5, %v1591_v4 }
 0x36f   : > { %1680 = vst [vmem:[#allocation2 + $0x48] sm:$0xff] %v1664_v6 }
 0x374   : > { %v1637_v8 = vpop.f32.mrf.mxu3 }
 0x375   : > { %v1665_v9 = vadd.f32 %v1637_v8, %v1592_v7 }
 0x377   : > { %1681 = vst [vmem:[#allocation2 + $0x40] sm:$0xff] %v1665_v9 }
 0x37c   : > { %v1639_v12 = vpop.f32.mrf.mxu3 }
 0x37d   : > { %v1666_v13 = vadd.f32 %v1639_v12, %v1593_v10 }
 0x37f   : > { %1682 = vst [vmem:[#allocation2 + $0x20] sm:$0xff] %v1666_v13 }
 0x384   : > { %v1642_v16 = vpop.f32.mrf.mxu3 }
 0x385   : > { %v1667_v21 = vadd.f32 %v1642_v16, %v1594_v15 }
 0x387   : > { %1683 = vst [vmem:[#allocation2 + $0x10] sm:$0xff] %v1667_v21 }
 0x38c   : > { %v1644_v11 = vpop.f32.mrf.mxu3 }
 0x38d   : > { %v1668_v23 = vadd.f32 %v1644_v11, %v1595_v22 }
 0x38f   : > { %1684 = vst [vmem:[#allocation2 + $0x38] sm:$0xff] %v1668_v23 }
 0x394   : > { %v1647_v25 = vpop.f32.mrf.mxu3 }
 0x395   : > { %v1669_v26 = vadd.f32 %v1647_v25, %v1596_v24 }
 0x397   : > { %1685 = vst [vmem:[#allocation2 + $0x60] sm:$0xff] %v1669_v26 }
 0x39c   : > { %v1649_v33 = vpop.f32.mrf.mxu3 }
 0x39d   : > { %v1670_v34 = vadd.f32 %v1649_v33, %v1597_v32 }
 0x39f   : > { %1686 = vst [vmem:[#allocation2 + $0x70] sm:$0xff] %v1670_v34 }
 0x3a4   : > { %v1652_v37 = vpop.f32.mrf.mxu3 }
 0x3a5   : > { %v1671_v38 = vadd.f32 %v1652_v37, %v1598_v35 }
 0x3a7   : > { %1687 = vst [vmem:[#allocation2 + $0x78] sm:$0xff] %v1671_v38 }
 0x3ab   : > { %1692 = sbr.rel (%p2343_p9) target bundleno = 1332 (0x534), region = 100 }
 0x3ac   : > { %v1654_v20 = vpop.f32.mrf.mxu3 }
 0x3ad   : > { %v1672_v39 = vadd.f32 %v1654_v20, %v1599_v14 }
 0x3af   : > { %1688 = vst [vmem:[#allocation2 + $0x28] sm:$0xff] %v1672_v39 }
 0x3b0   : > { %v1756_v40 = vld [vmem:[#allocation10 + $0x78] sm:$0xff]  ;;  %v1755_v30 = vld [vmem:[#allocation10 + $0x70] sm:$0xff]  ;;  %v1754_v63 = vld [vmem:[#allocation10 + $0x68] sm:$0xff] }
 0x3b1   : > { %v3311_v41 = vld [vmem:[#allocation8 + $0x78] sm:$0xff]  ;;  %1757 = vmatpush.msra.mxu0 %v1756_v40  ;;  %2506 = vmatpush.msra.mxu3 %v1756_v40  ;;  %v3313_v31 = vld [vmem:[#allocation8 + $0x70] sm:$0xff]  ;;  %v3316_v0 = vld [vmem:[#allocation8 + $0x68] sm:$0xff] }
 0x3b2   : > { %1822 = vmatpush.msra.mxu1 %v3311_v41  ;;  %v1753_v47 = vld [vmem:[#allocation10 + $0x60] sm:$0xff]  ;;  %v1752_v28 = vld [vmem:[#allocation10 + $0x58] sm:$0xff]  ;;  %v1751_v48 = vld [vmem:[#allocation10 + $0x50] sm:$0xff] }
 0x3b3   : > { %1758 = vmatpush.msra.mxu0 %v1755_v30  ;;  %2507 = vmatpush.msra.mxu3 %v1755_v30  ;;  %v3319_v27 = vld [vmem:[#allocation8 + $0x60] sm:$0xff]  ;;  %v3322_v29 = vld [vmem:[#allocation8 + $0x58] sm:$0xff]  ;;  %v3325_v49 = vld [vmem:[#allocation8 + $0x50] sm:$0xff] }
 0x3b4   : > { %1823 = vmatpush.msra.mxu1 %v3313_v31  ;;  %v1750_v1 = vld [vmem:[#allocation10 + $0x48] sm:$0xff]  ;;  %v1749_v18 = vld [vmem:[#allocation10 + $0x40] sm:$0xff]  ;;  %v1748_v42 = vld [vmem:[#allocation10 + $0x38] sm:$0xff] }
 0x3b5   : > { %1759 = vmatpush.msra.mxu0 %v1754_v63  ;;  %2508 = vmatpush.msra.mxu3 %v1754_v63  ;;  %v3328_v17 = vld [vmem:[#allocation8 + $0x48] sm:$0xff]  ;;  %v3331_v19 = vld [vmem:[#allocation8 + $0x40] sm:$0xff]  ;;  %v3334_v43 = vld [vmem:[#allocation8 + $0x38] sm:$0xff] }
 0x3b6   : > { %1824 = vmatpush.msra.mxu1 %v3316_v0  ;;  %v1747_v44 = vld [vmem:[#allocation10 + $0x30] sm:$0xff]  ;;  %v1746_v46 = vld [vmem:[#allocation10 + $0x28] sm:$0xff]  ;;  %v1745_v51 = vld [vmem:[#allocation10 + $0x20] sm:$0xff] }
 0x3b7   : > { %1760 = vmatpush.msra.mxu0 %v1753_v47  ;;  %2509 = vmatpush.msra.mxu3 %v1753_v47  ;;  %v1715_v45 = vld [vmem:[#allocation8 + $0x30] sm:$0xff]  ;;  %v1714_v50 = vld [vmem:[#allocation8 + $0x28] sm:$0xff]  ;;  %v1713_v52 = vld [vmem:[#allocation8 + $0x20] sm:$0xff] }
 0x3b8   : > { %1825 = vmatpush.msra.mxu1 %v3319_v27  ;;  %v1744_v53 = vld [vmem:[#allocation10 + $0x18] sm:$0xff]  ;;  %v1743_v55 = vld [vmem:[#allocation10 + $0x10] sm:$0xff]  ;;  %v1742_v57 = vld [vmem:[#allocation10 + $0x8] sm:$0xff] }
 0x3b9   : > { %1761 = vmatpush.msra.mxu0 %v1752_v28  ;;  %2510 = vmatpush.msra.mxu3 %v1752_v28  ;;  %v1712_v54 = vld [vmem:[#allocation8 + $0x18] sm:$0xff]  ;;  %v1711_v56 = vld [vmem:[#allocation8 + $0x10] sm:$0xff]  ;;  %v1710_v58 = vld [vmem:[#allocation8 + $0x8] sm:$0xff] }
 0x3ba   : > { %1826 = vmatpush.msra.mxu1 %v3322_v29  ;;  %v1741_v59 = vld [vmem:[#allocation10] sm:$0xff]  ;;  %v1725_v60 = vld [vmem:[#allocation2 + $0x30] sm:$0xff]  ;;  %v1694_v4 = vld [vmem:[%s3426_s0 + $0x8] sm:$0xff] }
 0x3bb   : > { %1762 = vmatpush.msra.mxu0 %v1751_v48  ;;  %2511 = vmatpush.msra.mxu3 %v1751_v48  ;;  %v1709_v36 = vld [vmem:[#allocation8] sm:$0xff]  ;;  %v1738_v3 = vld [vmem:[#allocation2 + $0x70] sm:$0xff]  ;;  %v1727_v5 = vld [vmem:[#allocation2 + $0x58] sm:$0xff] }
 0x3bc   : > { %1827 = vmatpush.msra.mxu1 %v3325_v49  ;;  %v1737_v61 = vld [vmem:[#allocation2 + $0x60] sm:$0xff]  ;;  %v1739_v6 = vld [vmem:[#allocation2 + $0x78] sm:$0xff]  ;;  %v1695_v7 = vld [vmem:[%s3426_s0 + $0x10] sm:$0xff] }
 0x3bd   : > { %1763 = vmatpush.msra.mxu0 %v1750_v1  ;;  %2512 = vmatpush.msra.mxu3 %v1750_v1  ;;  %v1693_v62 = vld [vmem:[%s3426_s0] sm:$0xff]  ;;  %v1728_v8 = vld [vmem:[#allocation2 + $0x18] sm:$0xff]  ;;  %v1740_v9 = vld [vmem:[#allocation2 + $0x28] sm:$0xff] }
 0x3be   : > { %1828 = vmatpush.msra.mxu1 %v3328_v17  ;;  %v1726_v2 = vld [vmem:[#allocation2] sm:$0xff]  ;;  %v1696_v10 = vld [vmem:[%s3426_s0 + $0x18] sm:$0xff]  ;;  %v1729_v12 = vld [vmem:[#allocation2 + $0x50] sm:$0xff] }
 0x3bf   : > { %1764 = vmatpush.msra.mxu0 %v1749_v18  ;;  %2513 = vmatpush.msra.mxu3 %v1749_v18  ;;  %v1697_v13 = vld [vmem:[%s3426_s0 + $0x20] sm:$0xff]  ;;  %v1730_v16 = vld [vmem:[#allocation2 + $0x68] sm:$0xff]  ;;  %v1699_v23 = vld [vmem:[%s3426_s0 + $0x30] sm:$0xff] }
 0x3c0   : > { %1829 = vmatpush.msra.mxu1 %v3331_v19  ;;  %v1705_v15 = vld [vmem:[%s3426_s0 + $0x60] sm:$0xff]  ;;  %v1698_v21 = vld [vmem:[%s3426_s0 + $0x28] sm:$0xff]  ;;  %v1707_v24 = vld [vmem:[%s3426_s0 + $0x70] sm:$0xff] }
 0x3c1   : > { %1765 = vmatpush.msra.mxu0 %v1748_v42  ;;  %2514 = vmatpush.msra.mxu3 %v1748_v42  ;;  %v1706_v22 = vld [vmem:[%s3426_s0 + $0x68] sm:$0xff]  ;;  %v1700_v26 = vld [vmem:[%s3426_s0 + $0x38] sm:$0xff]  ;;  %v1937_v34 = vld [vmem:[#allocation11 + $0x70] sm:$0xff] }
 0x3c2   : > { %1830 = vmatpush.msra.mxu1 %v3334_v43  ;;  %v1731_v11 = vld [vmem:[#allocation2 + $0x8] sm:$0xff]  ;;  %v1708_v32 = vld [vmem:[%s3426_s0 + $0x78] sm:$0xff]  ;;  %v1733_v37 = vld [vmem:[#allocation2 + $0x40] sm:$0xff] }
 0x3c3   : > { %1766 = vmatpush.msra.mxu0 %v1747_v44  ;;  %2515 = vmatpush.msra.mxu3 %v1747_v44  ;;  %v1732_v25 = vld [vmem:[#allocation2 + $0x48] sm:$0xff]  ;;  %v1938_v33 = vld [vmem:[#allocation11 + $0x78] sm:$0xff]  ;;  %v1935_v38 = vld [vmem:[#allocation11 + $0x60] sm:$0xff] }
 0x3c4   : > { %1831 = vmatpush.msra.mxu1 %v1715_v45  ;;  %1943 = vmatpush.msra.mxu2 %v1938_v33  ;;  %v1936_v35 = vld [vmem:[#allocation11 + $0x68] sm:$0xff]  ;;  %v1701_v14 = vld [vmem:[%s3426_s0 + $0x40] sm:$0xff]  ;;  %v1934_v20 = vld [vmem:[#allocation11 + $0x58] sm:$0xff] }
 0x3c5   : > { %1767 = vmatpush.msra.mxu0 %v1746_v46  ;;  %2516 = vmatpush.msra.mxu3 %v1746_v46  ;;  %v1933_v39 = vld [vmem:[#allocation11 + $0x50] sm:$0xff]  ;;  %v1932_v40 = vld [vmem:[#allocation11 + $0x48] sm:$0xff]  ;;  %v1931_v30 = vld [vmem:[#allocation11 + $0x40] sm:$0xff] }
 0x3c6   : > { %1832 = vmatpush.msra.mxu1 %v1714_v50  ;;  %1944 = vmatpush.msra.mxu2 %v1937_v34  ;;  %v1930_v63 = vld [vmem:[#allocation11 + $0x38] sm:$0xff]  ;;  %v1928_v47 = vld [vmem:[#allocation11 + $0x28] sm:$0xff]  ;;  %v1927_v28 = vld [vmem:[#allocation11 + $0x20] sm:$0xff] }
 0x3c7   : > { %1768 = vmatpush.msra.mxu0 %v1745_v51  ;;  %2517 = vmatpush.msra.mxu3 %v1745_v51  ;;  %v1736_v48 = vld [vmem:[#allocation2 + $0x38] sm:$0xff]  ;;  %v1924_v18 = vld [vmem:[#allocation11 + $0x8] sm:$0xff] }
 0x3c8   : > { %1833 = vmatpush.msra.mxu1 %v1713_v52  ;;  %1945 = vmatpush.msra.mxu2 %v1936_v35  ;;  %v1926_v1 = vld [vmem:[#allocation11 + $0x18] sm:$0xff] }
 0x3c9   : > { %1769 = vmatpush.msra.mxu0 %v1744_v53  ;;  %2518 = vmatpush.msra.mxu3 %v1744_v53 }
 0x3ca   : > { %1834 = vmatpush.msra.mxu1 %v1712_v54  ;;  %1946 = vmatpush.msra.mxu2 %v1935_v38 }
 0x3cb   : > { %1770 = vmatpush.msra.mxu0 %v1743_v55  ;;  %2519 = vmatpush.msra.mxu3 %v1743_v55 }
 0x3cc   : > { %1835 = vmatpush.msra.mxu1 %v1711_v56  ;;  %1947 = vmatpush.msra.mxu2 %v1934_v20 }
 0x3cd   : > { %1771 = vmatpush.msra.mxu0 %v1742_v57  ;;  %2520 = vmatpush.msra.mxu3 %v1742_v57 }
 0x3ce   : > { %1836 = vmatpush.msra.mxu1 %v1710_v58  ;;  %1948 = vmatpush.msra.mxu2 %v1933_v39 }
 0x3cf   : > { %1772 = vmatpush.msra.mxu0 %v1741_v59  ;;  %2521 = vmatpush.msra.mxu3 %v1741_v59 }
 0x3d0   : > { %1837 = vmatpush.msra.mxu1 %v1709_v36  ;;  %1773 = vmatmul.f32.vlgmr.msra.gmra.mxu0 %v1725_v60 }
 0x3d1   : > { %1809 = vmatmul.f32.vlgmr.msra.gmra.mxu3 %v1737_v61  ;;  %1838 = vmatmul.f32.vlgmr.msra.gmra.mxu1 %v1693_v62 }
 0x3d2   : > { %2522 = vmatpush.msrb.mxu3 %v3311_v41  ;;  %v1734_v41 = vld [vmem:[#allocation2 + $0x20] sm:$0xff]  ;;  %1949 = vmatpush.msra.mxu2 %v1932_v40 }
 0x3d4   : > { %2523 = vmatpush.msrb.mxu3 %v3313_v31  ;;  %v1702_v31 = vld [vmem:[%s3426_s0 + $0x48] sm:$0xff]  ;;  %1950 = vmatpush.msra.mxu2 %v1931_v30 }
 0x3d6   : > { %2524 = vmatpush.msrb.mxu3 %v3316_v0  ;;  %v1929_v0 = vld [vmem:[#allocation11 + $0x30] sm:$0xff]  ;;  %1951 = vmatpush.msra.mxu2 %v1930_v63 }
 0x3d8   : > { %2525 = vmatpush.msrb.mxu3 %v3319_v27  ;;  %1776 = vmatmul.f32.gmra.mxu0 %v1726_v2  ;;  %v1735_v27 = vld [vmem:[#allocation2 + $0x10] sm:$0xff] }
 0x3d9   : > { %1812 = vmatmul.f32.gmra.mxu3 %v1738_v3  ;;  %1841 = vmatmul.f32.gmra.mxu1 %v1694_v4 }
 0x3da   : > { %2526 = vmatpush.msrb.mxu3 %v3322_v29  ;;  %1952 = vmatpush.msra.mxu2 %v1929_v0  ;;  %v1703_v29 = vld [vmem:[%s3426_s0 + $0x50] sm:$0xff] }
 0x3dc   : > { %2527 = vmatpush.msrb.mxu3 %v3325_v49  ;;  %1953 = vmatpush.msra.mxu2 %v1928_v47  ;;  %v1704_v49 = vld [vmem:[%s3426_s0 + $0x58] sm:$0xff] }
 0x3de   : > { %2528 = vmatpush.msrb.mxu3 %v3328_v17  ;;  %1954 = vmatpush.msra.mxu2 %v1927_v28  ;;  %v1925_v17 = vld [vmem:[#allocation11 + $0x10] sm:$0xff] }
 0x3e0   : > { %2529 = vmatpush.msrb.mxu3 %v3331_v19  ;;  %1779 = vmatmul.f32.gmra.mxu0 %v1727_v5  ;;  %v1923_v19 = vld [vmem:[#allocation11] sm:$0xff] }
 0x3e1   : > { %1815 = vmatmul.f32.gmra.mxu3 %v1739_v6  ;;  %1844 = vmatmul.f32.gmra.mxu1 %v1695_v7 }
 0x3e2   : > { %2530 = vmatpush.msrb.mxu3 %v3334_v43  ;;  %1955 = vmatpush.msra.mxu2 %v1926_v1  ;;  %v3398_v43 = vld [vmem:[%s3437_s11] ss:$0 sm:$0xff] }
 0x3e4   : > { %2531 = vmatpush.msrb.mxu3 %v1715_v45  ;;  %1956 = vmatpush.msra.mxu2 %v1925_v17 }
 0x3e6   : > { %2532 = vmatpush.msrb.mxu3 %v1714_v50  ;;  %1957 = vmatpush.msra.mxu2 %v1924_v18 }
 0x3e8   : > { %2533 = vmatpush.msrb.mxu3 %v1713_v52  ;;  %1782 = vmatmul.f32.gmra.mxu0 %v1728_v8 }
 0x3e9   : > { %1818 = vmatmul.f32.gmra.mxu3 %v1740_v9  ;;  %1847 = vmatmul.f32.gmra.mxu1 %v1696_v10 }
 0x3ea   : > { %2534 = vmatpush.msrb.mxu3 %v1712_v54  ;;  %1958 = vmatpush.msra.mxu2 %v1923_v19 }
 0x3ec   : > { %2535 = vmatpush.msrb.mxu3 %v1711_v56 }
 0x3ee   : > { %2536 = vmatpush.msrb.mxu3 %v1710_v58 }
 0x3f0   : > { %2537 = vmatpush.msrb.mxu3 %v1709_v36  ;;  %1785 = vmatmul.f32.gmra.mxu0 %v1729_v12 }
 0x3f1   : > { %1850 = vmatmul.f32.gmra.mxu1 %v1697_v13  ;;  %1874 = vmatmul.f32.vlgmr.msrb.gmra.mxu3 %v1705_v15 }
 0x3f2   : > { %2538 = vmatpush.msra.mxu3 %v1938_v33 }
 0x3f4   : > { %2539 = vmatpush.msra.mxu3 %v1937_v34 }
 0x3f6   : > { %2540 = vmatpush.msra.mxu3 %v1936_v35 }
 0x3f8   : > { %1788 = vmatmul.f32.gmra.mxu0 %v1730_v16  ;;  %2541 = vmatpush.msra.mxu3 %v1935_v38 }
 0x3f9   : > { %1853 = vmatmul.f32.gmra.mxu1 %v1698_v21  ;;  %1877 = vmatmul.f32.gmra.mxu3 %v1706_v22 }
 0x3fa   : > { %2542 = vmatpush.msra.mxu3 %v1934_v20 }
 0x3fc   : > { %2543 = vmatpush.msra.mxu3 %v1933_v39 }
 0x3fe   : > { %2544 = vmatpush.msra.mxu3 %v1932_v40 }
 0x400   : > { %1791 = vmatmul.f32.gmra.mxu0 %v1731_v11  ;;  %2545 = vmatpush.msra.mxu3 %v1931_v30 }
 0x401   : > { %1856 = vmatmul.f32.gmra.mxu1 %v1699_v23  ;;  %1880 = vmatmul.f32.gmra.mxu3 %v1707_v24 }
 0x402   : > { %2546 = vmatpush.msra.mxu3 %v1930_v63 }
 0x404   : > { %2547 = vmatpush.msra.mxu3 %v1929_v0 }
 0x406   : > { %2548 = vmatpush.msra.mxu3 %v1928_v47 }
 0x408   : > { %1794 = vmatmul.f32.gmra.mxu0 %v1732_v25  ;;  %2549 = vmatpush.msra.mxu3 %v1927_v28 }
 0x409   : > { %1859 = vmatmul.f32.gmra.mxu1 %v1700_v26  ;;  %1883 = vmatmul.f32.gmra.mxu3 %v1708_v32 }
 0x40a   : > { %2550 = vmatpush.msra.mxu3 %v1926_v1 }
 0x40c   : > { %2551 = vmatpush.msra.mxu3 %v1925_v17 }
 0x40e   : > { %2552 = vmatpush.msra.mxu3 %v1924_v18 }
 0x410   : > { %1797 = vmatmul.f32.gmra.mxu0 %v1733_v37  ;;  %2553 = vmatpush.msra.mxu3 %v1923_v19 }
 0x411   : > { %1862 = vmatmul.f32.gmra.mxu1 %v1701_v14 }
 0x418   : > { %1800 = vmatmul.f32.gmra.mxu0 %v1734_v41 }
 0x419   : > { %1865 = vmatmul.f32.gmra.mxu1 %v1702_v31 }
 0x420   : > { %1803 = vmatmul.f32.gmra.mxu0 %v1735_v27 }
 0x421   : > { %1868 = vmatmul.f32.gmra.mxu1 %v1703_v29 }
 0x428   : > { %1806 = vmatmul.f32.gmra.mxu0 %v1736_v48 }
 0x429   : > { %1871 = vmatmul.f32.gmra.mxu1 %v1704_v49 }
 0x44d   : > { %v1774_v42 = vpop.f32.mrf.mxu0 }
 0x44e   : > { %v1839_v44 = vpop.f32.mrf.mxu1 }
 0x44f   : > { %v1840_v45 = vadd.f32 %v1839_v44, %v1774_v42 }
 0x451   : > { %v1891_v46 = vadd.f32 %v3398_v43, %v1840_v45 }
 0x453   : > { %v1907_v50 = vmax.f32 %v1891_v46, 0.0 }
 0x454   : > { %v1810_v51 = vpop.f32.mrf.mxu3 }
 0x455   : > { %1959 = vmatmul.f32.vlgmr.msra.gmra.mxu2 %v1907_v50  ;;  %v1777_v52 = vpop.f32.mrf.mxu0 }
 0x456   : > { %v1842_v53 = vpop.f32.mrf.mxu1 }
 0x457   : > { %v1843_v54 = vadd.f32 %v1842_v53, %v1777_v52 }
 0x459   : > { %v1892_v55 = vadd.f32 %v3398_v43, %v1843_v54 }
 0x45b   : > { %v1908_v56 = vmax.f32 %v1892_v55, 0.0 }
 0x45c   : > { %v1813_v57 = vpop.f32.mrf.mxu3 }
 0x45d   : > { %1962 = vmatmul.f32.gmra.mxu2 %v1908_v56  ;;  %v1780_v58 = vpop.f32.mrf.mxu0 }
 0x45e   : > { %v1845_v59 = vpop.f32.mrf.mxu1 }
 0x45f   : > { %v1846_v36 = vadd.f32 %v1845_v59, %v1780_v58 }
 0x461   : > { %v1893_v60 = vadd.f32 %v3398_v43, %v1846_v36 }
 0x463   : > { %v1909_v61 = vmax.f32 %v1893_v60, 0.0 }
 0x464   : > { %v1816_v62 = vpop.f32.mrf.mxu3 }
 0x465   : > { %1965 = vmatmul.f32.gmra.mxu2 %v1909_v61  ;;  %v1783_v2 = vpop.f32.mrf.mxu0 }
 0x466   : > { %v1848_v3 = vpop.f32.mrf.mxu1 }
 0x467   : > { %v1849_v4 = vadd.f32 %v1848_v3, %v1783_v2 }
 0x469   : > { %v1894_v5 = vadd.f32 %v3398_v43, %v1849_v4 }
 0x46b   : > { %v1910_v6 = vmax.f32 %v1894_v5, 0.0 }
 0x46c   : > { %v1819_v7 = vpop.f32.mrf.mxu3 }
 0x46d   : > { %1968 = vmatmul.f32.gmra.mxu2 %v1910_v6  ;;  %v1786_v8 = vpop.f32.mrf.mxu0 }
 0x46e   : > { %v1851_v9 = vpop.f32.mrf.mxu1 }
 0x46f   : > { %v1852_v10 = vadd.f32 %v1851_v9, %v1786_v8 }
 0x471   : > { %v1895_v12 = vadd.f32 %v3398_v43, %v1852_v10 }
 0x473   : > { %v1911_v13 = vmax.f32 %v1895_v12, 0.0 }
 0x474   : > { %v1875_v15 = vpop.f32.mrf.mxu3 }
 0x475   : > { %v1876_v16 = vadd.f32 %v1875_v15, %v1810_v51  ;;  %1971 = vmatmul.f32.gmra.mxu2 %v1911_v13  ;;  %v1789_v21 = vpop.f32.mrf.mxu0 }
 0x476   : > { %v1854_v22 = vpop.f32.mrf.mxu1 }
 0x477   : > { %v1903_v11 = vadd.f32 %v3398_v43, %v1876_v16  ;;  %v1855_v23 = vadd.f32 %v1854_v22, %v1789_v21 }
 0x479   : > { %v1919_v24 = vmax.f32 %v1903_v11, 0.0  ;;  %v1896_v25 = vadd.f32 %v3398_v43, %v1855_v23 }
 0x47b   : > { %1995 = vmatmul.f32.vlgmr.msra.gmra.mxu3 %v1919_v24  ;;  %v1912_v26 = vmax.f32 %v1896_v25, 0.0 }
 0x47c   : > { %v1878_v32 = vpop.f32.mrf.mxu3 }
 0x47d   : > { %v1879_v33 = vadd.f32 %v1878_v32, %v1813_v57  ;;  %1974 = vmatmul.f32.gmra.mxu2 %v1912_v26  ;;  %v1792_v34 = vpop.f32.mrf.mxu0 }
 0x47e   : > { %v1857_v35 = vpop.f32.mrf.mxu1 }
 0x47f   : > { %v1858_v37 = vadd.f32 %v1857_v35, %v1792_v34  ;;  %v1904_v38 = vadd.f32 %v3398_v43, %v1879_v33 }
 0x481   : > { %v1920_v14 = vmax.f32 %v1904_v38, 0.0  ;;  %v1897_v20 = vadd.f32 %v3398_v43, %v1858_v37 }
 0x483   : > { %1998 = vmatmul.f32.gmra.mxu3 %v1920_v14  ;;  %v1913_v39 = vmax.f32 %v1897_v20, 0.0 }
 0x484   : > { %v1881_v40 = vpop.f32.mrf.mxu3 }
 0x485   : > { %v1882_v41 = vadd.f32 %v1881_v40, %v1816_v62  ;;  %1977 = vmatmul.f32.gmra.mxu2 %v1913_v39  ;;  %v1795_v30 = vpop.f32.mrf.mxu0  ;;  %v2625_v62 = vld [vmem:[%s3439_s13] ss:$0 sm:$0xff] }
 0x486   : > { %v1860_v31 = vpop.f32.mrf.mxu1 }
 0x487   : > { %v1861_v63 = vadd.f32 %v1860_v31, %v1795_v30  ;;  %v1905_v0 = vadd.f32 %v3398_v43, %v1882_v41 }
 0x489   : > { %v1921_v47 = vmax.f32 %v1905_v0, 0.0  ;;  %v1898_v27 = vadd.f32 %v3398_v43, %v1861_v63 }
 0x48b   : > { %2001 = vmatmul.f32.gmra.mxu3 %v1921_v47  ;;  %v1914_v28 = vmax.f32 %v1898_v27, 0.0 }
 0x48c   : > { %v1884_v29 = vpop.f32.mrf.mxu3 }
 0x48d   : > { %v1885_v48 = vadd.f32 %v1884_v29, %v1819_v7  ;;  %1980 = vmatmul.f32.gmra.mxu2 %v1914_v28  ;;  %v1798_v49 = vpop.f32.mrf.mxu0 }
 0x48e   : > { %v1863_v1 = vpop.f32.mrf.mxu1 }
 0x48f   : > { %v1864_v17 = vadd.f32 %v1863_v1, %v1798_v49  ;;  %v1906_v18 = vadd.f32 %v3398_v43, %v1885_v48 }
 0x491   : > { %v1922_v19 = vmax.f32 %v1906_v18, 0.0  ;;  %v1899_v42 = vadd.f32 %v3398_v43, %v1864_v17 }
 0x493   : > { %2004 = vmatmul.f32.gmra.mxu3 %v1922_v19  ;;  %v1915_v44 = vmax.f32 %v1899_v42, 0.0 }
 0x495   : > { %1983 = vmatmul.f32.gmra.mxu2 %v1915_v44  ;;  %v1801_v45 = vpop.f32.mrf.mxu0 }
 0x496   : > { %v1866_v46 = vpop.f32.mrf.mxu1 }
 0x497   : > { %v1867_v50 = vadd.f32 %v1866_v46, %v1801_v45 }
 0x499   : > { %v1900_v51 = vadd.f32 %v3398_v43, %v1867_v50 }
 0x49b   : > { %v1916_v52 = vmax.f32 %v1900_v51, 0.0 }
 0x49d   : > { %1986 = vmatmul.f32.gmra.mxu2 %v1916_v52  ;;  %v1804_v53 = vpop.f32.mrf.mxu0 }
 0x49e   : > { %v1869_v54 = vpop.f32.mrf.mxu1 }
 0x49f   : > { %v1870_v55 = vadd.f32 %v1869_v54, %v1804_v53 }
 0x4a1   : > { %v1901_v56 = vadd.f32 %v3398_v43, %v1870_v55 }
 0x4a3   : > { %v1917_v57 = vmax.f32 %v1901_v56, 0.0 }
 0x4a5   : > { %1989 = vmatmul.f32.gmra.mxu2 %v1917_v57  ;;  %v1807_v58 = vpop.f32.mrf.mxu0 }
 0x4a6   : > { %v1872_v59 = vpop.f32.mrf.mxu1 }
 0x4a7   : > { %v1873_v36 = vadd.f32 %v1872_v59, %v1807_v58 }
 0x4a9   : > { %v1902_v60 = vadd.f32 %v3398_v43, %v1873_v36 }
 0x4ab   : > { %v1918_v61 = vmax.f32 %v1902_v60, 0.0 }
 0x4ad   : > { %1992 = vmatmul.f32.gmra.mxu2 %v1918_v61 }
 0x4d8   : > { %v1960_v2 = vpop.f32.mrf.mxu2 }
 0x4d9   : > { %v1961_v3 = vadd.f32 %v2625_v62, %v1960_v2 }
 0x4db   : > { %2008 = vst [vmem:[#allocation13] sm:$0xff] %v1961_v3 }
 0x4e0   : > { %v1963_v4 = vpop.f32.mrf.mxu2 }
 0x4e1   : > { %v1964_v5 = vadd.f32 %v2625_v62, %v1963_v4 }
 0x4e3   : > { %2009 = vst [vmem:[#allocation13 + $0x8] sm:$0xff] %v1964_v5 }
 0x4e8   : > { %v1966_v6 = vpop.f32.mrf.mxu2 }
 0x4e9   : > { %v1967_v7 = vadd.f32 %v2625_v62, %v1966_v6 }
 0x4eb   : > { %2010 = vst [vmem:[#allocation13 + $0x10] sm:$0xff] %v1967_v7 }
 0x4f0   : > { %v1969_v8 = vpop.f32.mrf.mxu2 }
 0x4f1   : > { %v1970_v9 = vadd.f32 %v2625_v62, %v1969_v8 }
 0x4f3   : > { %2011 = vst [vmem:[#allocation13 + $0x18] sm:$0xff] %v1970_v9 }
 0x4f8   : > { %v1972_v10 = vpop.f32.mrf.mxu2 }
 0x4f9   : > { %v1973_v43 = vadd.f32 %v2625_v62, %v1972_v10 }
 0x4fb   : > { %2012 = vst [vmem:[#allocation13 + $0x20] sm:$0xff] %v1973_v43 }
 0x4fe   : > { %v1996_v12 = vpop.f32.mrf.mxu3 }
 0x4ff   : > { %v1997_v13 = vadd.f32 %v2625_v62, %v1996_v12 }
 0x500   : > { %v1975_v15 = vpop.f32.mrf.mxu2 }
 0x501   : > { %2020 = vst [vmem:[#allocation13 + $0x60] sm:$0xff] %v1997_v13  ;;  %v1976_v16 = vadd.f32 %v2625_v62, %v1975_v15 }
 0x503   : > { %2013 = vst [vmem:[#allocation13 + $0x28] sm:$0xff] %v1976_v16 }
 0x506   : > { %v1999_v21 = vpop.f32.mrf.mxu3 }
 0x507   : > { %v2000_v22 = vadd.f32 %v2625_v62, %v1999_v21 }
 0x508   : > { %v1978_v11 = vpop.f32.mrf.mxu2 }
 0x509   : > { %2021 = vst [vmem:[#allocation13 + $0x68] sm:$0xff] %v2000_v22  ;;  %v1979_v23 = vadd.f32 %v2625_v62, %v1978_v11 }
 0x50b   : > { %2014 = vst [vmem:[#allocation13 + $0x30] sm:$0xff] %v1979_v23 }
 0x50e   : > { %v2002_v24 = vpop.f32.mrf.mxu3 }
 0x50f   : > { %v2003_v25 = vadd.f32 %v2625_v62, %v2002_v24 }
 0x510   : > { %v1981_v26 = vpop.f32.mrf.mxu2 }
 0x511   : > { %2022 = vst [vmem:[#allocation13 + $0x70] sm:$0xff] %v2003_v25  ;;  %v1982_v32 = vadd.f32 %v2625_v62, %v1981_v26 }
 0x513   : > { %2015 = vst [vmem:[#allocation13 + $0x38] sm:$0xff] %v1982_v32 }
 0x516   : > { %v2005_v33 = vpop.f32.mrf.mxu3 }
 0x517   : > { %v2006_v34 = vadd.f32 %v2625_v62, %v2005_v33 }
 0x518   : > { %v1984_v35 = vpop.f32.mrf.mxu2 }
 0x519   : > { %2023 = vst [vmem:[#allocation13 + $0x78] sm:$0xff] %v2006_v34  ;;  %v1985_v37 = vadd.f32 %v2625_v62, %v1984_v35 }
 0x51b   : > { %2016 = vst [vmem:[#allocation13 + $0x40] sm:$0xff] %v1985_v37 }
 0x520   : > { %v1987_v38 = vpop.f32.mrf.mxu2 }
 0x521   : > { %v1988_v14 = vadd.f32 %v2625_v62, %v1987_v38 }
 0x523   : > { %2017 = vst [vmem:[#allocation13 + $0x48] sm:$0xff] %v1988_v14 }
 0x528   : > { %v1990_v20 = vpop.f32.mrf.mxu2 }
 0x529   : > { %v1991_v39 = vadd.f32 %v2625_v62, %v1990_v20 }
 0x52b   : > { %2018 = vst [vmem:[#allocation13 + $0x50] sm:$0xff] %v1991_v39 }
 0x530   : > { %v1993_v40 = vpop.f32.mrf.mxu2 }
 0x531   : > { %v1994_v41 = vadd.f32 %v2625_v62, %v1993_v40 }
 0x533   : > { %2019 = vst [vmem:[#allocation13 + $0x58] sm:$0xff] %v1994_v41 }
 0x534 PF: > { %p2595_p10 = scmp.eq.s32.totalorder %s2896_s17, 1  ;;  %s2809_s9 = smov [#allocation13]  }
 0x535   : > { %s2029_s18 = sshll.u32 %s2809_s9, 4  ;;  %s3450_s27 = sld [smem:[#allocation21_spill]]  ;;  %s2030_s18 = int_to_ptr.vmem [resolvable:$true] %s2029_s18 }
 0x536   : > { %s2810_s15 = smov 128   ;;  %s2811_s21 = smov 8  }
 0x53b   : > { %s2031_s30 = sshll.u32 %s3450_s27, 4  ;;  %s2032_s30 = int_to_ptr.hbm [resolvable:$true] %s2031_s30 }
 0x53c   : > { %2571 = dma.vmem_to_hbm [thread:$0]  (%p2595_p10), %s2030_s18, 2048, %s2032_s30, [#allocation7], %s2810_s15, %s2810_s15, %s2811_s21  }
 0x53d   : > { %2791 = dma.done.wait (%p2595_p10), [#allocation7], 2048  }
 0x53e   : > { %2793 = vsyncadd (%p2595_p10), [#allocation7], 4294965248 }
 0x53f PF: > { %s3451_s22 = sld [smem:[#allocation18_spill]] }
 0x545   : > { %s28_s29 = sadd.s32 1, %s3451_s22  }
 0x546   : > { %p25_p11 = scmp.ge.s32.totalorder %s28_s29, 4  }
 0x548   :  { %27 = sbr.rel (!%p25_p11) target bundleno = 8 (0x8), region = 137 }
 0x54d   :  { %2048 = vsyncpa [#allocation6], 1 }
 0x54e   :  { %2050 = vsyncpa [#allocation6 + $0x1], 1 }
 0x54f   :  { %2051 = vsyncpa [#allocation9], 1 }
 0x550   :  { %2052 = vsyncpa [#allocation12], 1 }
 0x551   :  { %2053 = vsyncpa [#allocation7], 1 }
 0x552   :  { %2055 = vsyncpa [#allocation7 + $0x1], 1 }

</bundles_post_ra>
